<compile_context>
chip_gen: v7x
topology: tpu7x:2x2x1
jax: 0.10.0
libtpu: 0.0.40
codegen_flags: <defaults>
</compile_context>

<pallas_src>
import jax
import jax.numpy as jnp
from jax import lax
from jax.experimental import pallas as pl
from jax.experimental.pallas import tpu as pltpu

_OUT = 5      # output dim of the collapsed fc1/fc2/output head
_PAD = 128    # lane-padded width for a dense final store


# ----------------------------- kernel helpers -------------------------------

def _layer_norm(x, g, b, eps=1e-5):
    mu = jnp.mean(x, axis=-1, keepdims=True)
    xc = x - mu
    var = jnp.mean(xc * xc, axis=-1, keepdims=True)
    return xc * lax.rsqrt(var + eps) * g + b


def _make_kernel(L, B, Din, E, H, NL):
    hd = E // H

    def kernel(x_ref, wemb_ref, bemb_ref,
               wqkv_ref, bqkv_ref, wo_ref, bo_ref,
               g1_ref, be1_ref, w1_ref, fb1_ref, w2_ref, fb2_ref,
               g2_ref, be2_ref, whead_ref, bhead_ref, o_ref):
        # batch-stacked activations: rows ordered (b, l), batch-major -> (B*L, E)
        h = jnp.dot(x_ref[...], wemb_ref[...],
                    preferred_element_type=jnp.float32) + bemb_ref[...]

        for l in range(NL):                      # NL is tiny (2) -> unrolled
            # fused (scaled-Q | K | V) projection: one matmul per layer
            qkv = jnp.dot(h, wqkv_ref[l],
                          preferred_element_type=jnp.float32) + bqkv_ref[l]
            q = qkv[:, :E]
            k = qkv[:, E:2 * E]
            v = qkv[:, 2 * E:]

            # multi-head attention over the length axis, batched over B per
            # head; each head's output is matmul-accumulated straight into the
            # out-projection (wo rows sliced per head -> no lane concat).
            a = bo_ref[l]                                      # (1, E)
            wo_l = wo_ref[l]                                   # (E, E)
            for hh in range(H):
                s0 = hh * hd
                qh = q[:, s0:s0 + hd].reshape(B, L, hd)
                kh = k[:, s0:s0 + hd].reshape(B, L, hd)
                vh = v[:, s0:s0 + hd].reshape(B, L, hd)
                sc = jnp.einsum("bld,bmd->blm", qh, kh,
                                preferred_element_type=jnp.float32)
                sc = sc - jnp.max(sc, axis=-1, keepdims=True)
                p = jnp.exp(sc)
                p = p / jnp.sum(p, axis=-1, keepdims=True)
                oh = jnp.einsum("blm,bmd->bld", p, vh,
                                preferred_element_type=jnp.float32)
                a = a + jnp.dot(oh.reshape(B * L, hd),
                                wo_l[s0:s0 + hd, :],
                                preferred_element_type=jnp.float32)

            # post-norm encoder layer (norm_first=False), ReLU feed-forward
            h = _layer_norm(h + a, g1_ref[l], be1_ref[l])
            ff = jnp.maximum(
                jnp.dot(h, w1_ref[l],
                        preferred_element_type=jnp.float32) + fb1_ref[l], 0.0)
            ff = jnp.dot(ff, w2_ref[l],
                         preferred_element_type=jnp.float32) + fb2_ref[l]
            h = _layer_norm(h + ff, g2_ref[l], be2_ref[l])

        # permute(0,2,1) + AdaptiveAvgPool1d(1).squeeze(-1) == mean over batch
        pooled = h[0:L, :]
        for b in range(1, B):
            pooled = pooled + h[b * L:(b + 1) * L, :]
        pooled = pooled * (1.0 / B)

        # collapsed fc1/fc2/output head, lane-padded to 128 for a dense store
        y = jnp.dot(pooled, whead_ref[...],
                    preferred_element_type=jnp.float32) + bhead_ref[...]
        o_ref[...] = jax.nn.sigmoid(y)

    return kernel


# ------------------------------ host wrapper ---------------------------------

def transformer_forward(x, params, *, num_heads, num_layers):
    L, B, Din = x.shape
    E = params["w_emb"].shape[0]
    H, NL = num_heads, num_layers
    hd = E // H
    scale = float(hd) ** -0.5

    # --- host-side parameter prep (layout plumbing, done once per call) ------
    w_emb_t = params["w_emb"].T.astype(jnp.float32)            # (Din, E)
    b_emb = params["b_emb"].astype(jnp.float32)                # (1, E)

    # fused QKV, pre-transposed to (E, 3E); 1/sqrt(hd) folded into the Q slice
    wq_t = jnp.swapaxes(params["wq"], 1, 2) * scale            # (NL, E, E)
    wk_t = jnp.swapaxes(params["wk"], 1, 2)
    wv_t = jnp.swapaxes(params["wv"], 1, 2)
    w_qkv = jnp.concatenate([wq_t, wk_t, wv_t], axis=-1)       # (NL, E, 3E)
    b_qkv = jnp.concatenate(
        [params["bq"] * scale, params["bk"], params["bv"]], axis=-1)  # (NL,1,3E)

    wo_t = jnp.swapaxes(params["wo"], 1, 2)                    # (NL, E, E)
    w1_t = jnp.swapaxes(params["w1"], 1, 2)                    # (NL, E, FF)
    w2_t = jnp.swapaxes(params["w2"], 1, 2)                    # (NL, FF, E)

    # collapse fc1 -> fc2 -> output (no nonlinearities between) into one matmul
    w1h = params["fc1_w"].T                                    # (E, 30)
    w2h = params["fc2_w"].T                                    # (30, 20)
    w3h = params["out_w"].T                                    # (20, 5)
    w_head = w1h @ w2h @ w3h                                   # (E, 5)
    b_head = (params["fc1_b"] @ w2h @ w3h
              + params["fc2_b"] @ w3h + params["out_b"])       # (1, 5)
    w_head_pad = jnp.zeros((E, _PAD), jnp.float32).at[:, :_OUT].set(w_head)
    b_head_pad = jnp.zeros((1, _PAD), jnp.float32).at[:, :_OUT].set(b_head)

    # batch-stack the input: (L, B, Din) -> (B*L, Din), batch-major rows
    x_flat = jnp.transpose(x.astype(jnp.float32), (1, 0, 2)).reshape(B * L, Din)

    args = [x_flat, w_emb_t, b_emb, w_qkv, b_qkv, wo_t, params["bo"],
            params["g1"], params["beta1"], w1_t, params["b1"],
            w2_t, params["b2"], params["g2"], params["beta2"],
            w_head_pad, b_head_pad]

    kernel = _make_kernel(L, B, Din, E, H, NL)
    vmem = pl.BlockSpec(memory_space=pltpu.MemorySpace.VMEM)
    out = pl.pallas_call(
        kernel,
        out_shape=jax.ShapeDtypeStruct((L, _PAD), jnp.float32),
        in_specs=[vmem] * len(args),
        out_specs=vmem,
    )(*args)
    return out[:, :_OUT]


def init_params(key, *, in_dim=20, embedding_size=32, num_heads=4,
                ff_dim=32, num_layers=2):
    E, FF, NL = embedding_size, ff_dim, num_layers
    keys = iter(jax.random.split(key, 32))

    def w(shape, scale=0.05):
        return (scale * jax.random.normal(next(keys), shape)).astype(jnp.float32)

    zeros = lambda s: jnp.zeros(s, jnp.float32)
    ones = lambda s: jnp.ones(s, jnp.float32)

    return {
        "w_emb": w((E, in_dim)), "b_emb": w((1, E), 0.01),
        "wq": w((NL, E, E)), "bq": zeros((NL, 1, E)),
        "wk": w((NL, E, E)), "bk": zeros((NL, 1, E)),
        "wv": w((NL, E, E)), "bv": zeros((NL, 1, E)),
        "wo": w((NL, E, E)), "bo": zeros((NL, 1, E)),
        "g1": ones((NL, 1, E)), "beta1": zeros((NL, 1, E)),
        "w1": w((NL, FF, E)), "b1": w((NL, 1, FF), 0.01),
        "w2": w((NL, E, FF)), "b2": w((NL, 1, E), 0.01),
        "g2": ones((NL, 1, E)), "beta2": zeros((NL, 1, E)),
        "fc1_w": w((30, E)), "fc1_b": w((1, 30), 0.01),
        "fc2_w": w((20, 30)), "fc2_b": w((1, 20), 0.01),
        "out_w": w((5, 20)), "out_b": w((1, 5), 0.01),
    }


# --------------------------- pure-JAX reference ------------------------------

def reference_forward(x, p, *, num_heads, num_layers):
    L, B, Din = x.shape
    E = p["w_emb"].shape[0]
    H, hd = num_heads, p["w_emb"].shape[0] // num_heads

    def lin(t, w, b):
        return jnp.einsum("...i,oi->...o", t, w) + b.reshape(-1)

    def ln(t, g, bb, eps=1e-5):
        mu = t.mean(-1, keepdims=True)
        var = ((t - mu) ** 2).mean(-1, keepdims=True)
        return (t - mu) / jnp.sqrt(var + eps) * g.reshape(-1) + bb.reshape(-1)

    h = lin(x.astype(jnp.float32), p["w_emb"], p["b_emb"])     # (L, B, E)
    for l in range(num_layers):
        q = (lin(h, p["wq"][l], p["bq"][l]) / (hd ** 0.5)).reshape(L, B, H, hd)
        k = lin(h, p["wk"][l], p["bk"][l]).reshape(L, B, H, hd)
        v = lin(h, p["wv"][l], p["bv"][l]).reshape(L, B, H, hd)
        sc = jnp.einsum("lbhd,mbhd->bhlm", q, k)
        pr = jax.nn.softmax(sc, axis=-1)
        o = jnp.einsum("bhlm,mbhd->lbhd", pr, v).reshape(L, B, E)
        h = ln(h + lin(o, p["wo"][l], p["bo"][l]), p["g1"][l], p["beta1"][l])
        ff = jax.nn.relu(lin(h, p["w1"][l], p["b1"][l]))
        h = ln(h + lin(ff, p["w2"][l], p["b2"][l]), p["g2"][l], p["beta2"][l])
    pooled = h.mean(axis=1)                                    # (L, E)
    y = lin(lin(lin(pooled, p["fc1_w"], p["fc1_b"]),
                p["fc2_w"], p["fc2_b"]),
            p["out_w"], p["out_b"])
    return jax.nn.sigmoid(y)


# ---------------------------------- main --------------------------------------

if __name__ == "__main__":
    L, B, Din = 8, 2, 20            # input_length=8, batch=2, feature dim 20
    E, H, FF, NL = 32, 4, 32, 2     # embedding_size, num_heads, ff_dim, layers

    key = jax.random.PRNGKey(0)
    kx, kp = jax.random.split(key)
    x = jax.random.normal(kx, (L, B, Din), dtype=jnp.float32)
    params = init_params(kp, in_dim=Din, embedding_size=E, num_heads=H,
                         ff_dim=FF, num_layers=NL)

    out = transformer_forward(x, params, num_heads=H, num_layers=NL)
    out = jax.block_until_ready(out)

    ref = reference_forward(x, params, num_heads=H, num_layers=NL)
    assert out.shape == (L, 5), out.shape
    if not jnp.allclose(out, ref, atol=1e-4, rtol=1e-4):
        raise AssertionError(
            f"kernel/reference mismatch, max abs err = "
            f"{float(jnp.max(jnp.abs(out - ref)))}")
    print("KERNEL_OK")
</pallas_src>

<mosaic_0001>
module attributes {stable_mosaic.version = 11 : i64} {
  func.func @kernel(%arg0: memref<16x20xf32, #tpu.memory_space<vmem>>, %arg1: memref<20x32xf32, #tpu.memory_space<vmem>>, %arg2: memref<1x32xf32, #tpu.memory_space<vmem>>, %arg3: memref<2x32x96xf32, #tpu.memory_space<vmem>>, %arg4: memref<2x1x96xf32, #tpu.memory_space<vmem>>, %arg5: memref<2x32x32xf32, #tpu.memory_space<vmem>>, %arg6: memref<2x1x32xf32, #tpu.memory_space<vmem>>, %arg7: memref<2x1x32xf32, #tpu.memory_space<vmem>>, %arg8: memref<2x1x32xf32, #tpu.memory_space<vmem>>, %arg9: memref<2x32x32xf32, #tpu.memory_space<vmem>>, %arg10: memref<2x1x32xf32, #tpu.memory_space<vmem>>, %arg11: memref<2x32x32xf32, #tpu.memory_space<vmem>>, %arg12: memref<2x1x32xf32, #tpu.memory_space<vmem>>, %arg13: memref<2x1x32xf32, #tpu.memory_space<vmem>>, %arg14: memref<2x1x32xf32, #tpu.memory_space<vmem>>, %arg15: memref<32x128xf32, #tpu.memory_space<vmem>>, %arg16: memref<1x128xf32, #tpu.memory_space<vmem>>, %arg17: memref<8x128xf32, #tpu.memory_space<vmem>>) attributes {dimension_semantics = [], scalar_prefetch = 0 : i64, scratch_operands = 0 : i64, tpu.core_type = #tpu.core_type<tc>} {
    %c0 = arith.constant 0 : index
    %c0_0 = arith.constant 0 : index
    %0 = vector.load %arg0[%c0, %c0_0] : memref<16x20xf32, #tpu.memory_space<vmem>>, vector<16x20xf32>
    %c0_1 = arith.constant 0 : index
    %c0_2 = arith.constant 0 : index
    %1 = vector.load %arg1[%c0_1, %c0_2] : memref<20x32xf32, #tpu.memory_space<vmem>>, vector<20x32xf32>
    %cst = arith.constant dense<0.000000e+00> : vector<16x32xf32>
    %2 = tpu.matmul %0, %1, %cst {dimension_numbers = #tpu.dot_dimension_numbers<[1], [0], [0], [1], [0, 0, 1, 1], [], []>} : vector<16x20xf32>, vector<20x32xf32>, vector<16x32xf32> -> vector<16x32xf32>
    %c0_3 = arith.constant 0 : index
    %c0_4 = arith.constant 0 : index
    %3 = vector.load %arg2[%c0_3, %c0_4] : memref<1x32xf32, #tpu.memory_space<vmem>>, vector<1x32xf32>
    %4 = vector.broadcast %3 : vector<1x32xf32> to vector<16x32xf32>
    %5 = arith.addf %2, %4 : vector<16x32xf32>
    %c0_5 = arith.constant 0 : index
    %c0_6 = arith.constant 0 : index
    %c0_7 = arith.constant 0 : index
    %6 = vector.load %arg3[%c0_5, %c0_6, %c0_7] : memref<2x32x96xf32, #tpu.memory_space<vmem>>, vector<1x32x96xf32>
    %7 = vector.shape_cast %6 : vector<1x32x96xf32> to vector<32x96xf32>
    %cst_8 = arith.constant dense<0.000000e+00> : vector<16x96xf32>
    %8 = tpu.matmul %5, %7, %cst_8 {dimension_numbers = #tpu.dot_dimension_numbers<[1], [0], [0], [1], [0, 0, 1, 1], [], []>} : vector<16x32xf32>, vector<32x96xf32>, vector<16x96xf32> -> vector<16x96xf32>
    %c0_9 = arith.constant 0 : index
    %c0_10 = arith.constant 0 : index
    %c0_11 = arith.constant 0 : index
    %9 = vector.load %arg4[%c0_9, %c0_10, %c0_11] : memref<2x1x96xf32, #tpu.memory_space<vmem>>, vector<1x1x96xf32>
    %10 = vector.shape_cast %9 : vector<1x1x96xf32> to vector<1x96xf32>
    %11 = vector.broadcast %10 : vector<1x96xf32> to vector<16x96xf32>
    %12 = arith.addf %8, %11 : vector<16x96xf32>
    %13 = vector.extract_strided_slice %12 {offsets = [0, 0], sizes = [16, 32], strides = [1, 1]} : vector<16x96xf32> to vector<16x32xf32>
    %14 = vector.extract_strided_slice %12 {offsets = [0, 32], sizes = [16, 32], strides = [1, 1]} : vector<16x96xf32> to vector<16x32xf32>
    %15 = vector.extract_strided_slice %12 {offsets = [0, 64], sizes = [16, 32], strides = [1, 1]} : vector<16x96xf32> to vector<16x32xf32>
    %c0_12 = arith.constant 0 : index
    %c0_13 = arith.constant 0 : index
    %c0_14 = arith.constant 0 : index
    %16 = vector.load %arg6[%c0_12, %c0_13, %c0_14] : memref<2x1x32xf32, #tpu.memory_space<vmem>>, vector<1x1x32xf32>
    %17 = vector.shape_cast %16 : vector<1x1x32xf32> to vector<1x32xf32>
    %c0_15 = arith.constant 0 : index
    %c0_16 = arith.constant 0 : index
    %c0_17 = arith.constant 0 : index
    %18 = vector.load %arg5[%c0_15, %c0_16, %c0_17] : memref<2x32x32xf32, #tpu.memory_space<vmem>>, vector<1x32x32xf32>
    %19 = vector.shape_cast %18 : vector<1x32x32xf32> to vector<32x32xf32>
    %20 = vector.extract_strided_slice %13 {offsets = [0, 0], sizes = [16, 8], strides = [1, 1]} : vector<16x32xf32> to vector<16x8xf32>
    %21 = vector.shape_cast %20 : vector<16x8xf32> to vector<2x8x8xf32>
    %22 = vector.extract_strided_slice %14 {offsets = [0, 0], sizes = [16, 8], strides = [1, 1]} : vector<16x32xf32> to vector<16x8xf32>
    %23 = vector.shape_cast %22 : vector<16x8xf32> to vector<2x8x8xf32>
    %24 = vector.extract_strided_slice %15 {offsets = [0, 0], sizes = [16, 8], strides = [1, 1]} : vector<16x32xf32> to vector<16x8xf32>
    %25 = vector.shape_cast %24 : vector<16x8xf32> to vector<2x8x8xf32>
    "tpu.trace_start"() <{level = 10 : i32, message = "bld,bmd->blm"}> : () -> ()
    %cst_18 = arith.constant dense<0.000000e+00> : vector<2x8x8xf32>
    %26 = tpu.matmul %21, %23, %cst_18 {dimension_numbers = #tpu.dot_dimension_numbers<[2], [2], [1], [1], [0, 0, 0, 1, 1, 1], [0], [0]>} : vector<2x8x8xf32>, vector<2x8x8xf32>, vector<2x8x8xf32> -> vector<2x8x8xf32>
    "tpu.trace_stop"() : () -> ()
    %cst_19 = arith.constant dense<0xFF800000> : vector<2x8xf32>
    %27 = vector.multi_reduction <maximumf>, %26, %cst_19 [2] : vector<2x8x8xf32> to vector<2x8xf32>
    %28 = vector.shape_cast %27 : vector<2x8xf32> to vector<2x8x1xf32>
    %29 = vector.broadcast %28 : vector<2x8x1xf32> to vector<2x8x8xf32>
    %30 = arith.subf %26, %29 : vector<2x8x8xf32>
    %31 = math.exp %30 : vector<2x8x8xf32>
    %cst_20 = arith.constant dense<0.000000e+00> : vector<2x8xf32>
    %32 = vector.multi_reduction <add>, %31, %cst_20 [2] : vector<2x8x8xf32> to vector<2x8xf32>
    %33 = vector.shape_cast %32 : vector<2x8xf32> to vector<2x8x1xf32>
    %34 = vector.broadcast %33 : vector<2x8x1xf32> to vector<2x8x8xf32>
    %35 = arith.divf %31, %34 : vector<2x8x8xf32>
    "tpu.trace_start"() <{level = 10 : i32, message = "blm,bmd->bld"}> : () -> ()
    %cst_21 = arith.constant dense<0.000000e+00> : vector<2x8x8xf32>
    %36 = tpu.matmul %35, %25, %cst_21 {dimension_numbers = #tpu.dot_dimension_numbers<[2], [1], [1], [2], [0, 0, 0, 1, 1, 2], [0], [0]>} : vector<2x8x8xf32>, vector<2x8x8xf32>, vector<2x8x8xf32> -> vector<2x8x8xf32>
    "tpu.trace_stop"() : () -> ()
    %37 = vector.shape_cast %36 : vector<2x8x8xf32> to vector<16x8xf32>
    %38 = vector.extract_strided_slice %19 {offsets = [0, 0], sizes = [8, 32], strides = [1, 1]} : vector<32x32xf32> to vector<8x32xf32>
    %cst_22 = arith.constant dense<0.000000e+00> : vector<16x32xf32>
    %39 = tpu.matmul %37, %38, %cst_22 {dimension_numbers = #tpu.dot_dimension_numbers<[1], [0], [0], [1], [0, 0, 1, 1], [], []>} : vector<16x8xf32>, vector<8x32xf32>, vector<16x32xf32> -> vector<16x32xf32>
    %40 = vector.broadcast %17 : vector<1x32xf32> to vector<16x32xf32>
    %41 = arith.addf %40, %39 : vector<16x32xf32>
    %42 = vector.extract_strided_slice %13 {offsets = [0, 8], sizes = [16, 8], strides = [1, 1]} : vector<16x32xf32> to vector<16x8xf32>
    %43 = vector.shape_cast %42 : vector<16x8xf32> to vector<2x8x8xf32>
    %44 = vector.extract_strided_slice %14 {offsets = [0, 8], sizes = [16, 8], strides = [1, 1]} : vector<16x32xf32> to vector<16x8xf32>
    %45 = vector.shape_cast %44 : vector<16x8xf32> to vector<2x8x8xf32>
    %46 = vector.extract_strided_slice %15 {offsets = [0, 8], sizes = [16, 8], strides = [1, 1]} : vector<16x32xf32> to vector<16x8xf32>
    %47 = vector.shape_cast %46 : vector<16x8xf32> to vector<2x8x8xf32>
    "tpu.trace_start"() <{level = 10 : i32, message = "bld,bmd->blm"}> : () -> ()
    %cst_23 = arith.constant dense<0.000000e+00> : vector<2x8x8xf32>
    %48 = tpu.matmul %43, %45, %cst_23 {dimension_numbers = #tpu.dot_dimension_numbers<[2], [2], [1], [1], [0, 0, 0, 1, 1, 1], [0], [0]>} : vector<2x8x8xf32>, vector<2x8x8xf32>, vector<2x8x8xf32> -> vector<2x8x8xf32>
    "tpu.trace_stop"() : () -> ()
    %cst_24 = arith.constant dense<0xFF800000> : vector<2x8xf32>
    %49 = vector.multi_reduction <maximumf>, %48, %cst_24 [2] : vector<2x8x8xf32> to vector<2x8xf32>
    %50 = vector.shape_cast %49 : vector<2x8xf32> to vector<2x8x1xf32>
    %51 = vector.broadcast %50 : vector<2x8x1xf32> to vector<2x8x8xf32>
    %52 = arith.subf %48, %51 : vector<2x8x8xf32>
    %53 = math.exp %52 : vector<2x8x8xf32>
    %cst_25 = arith.constant dense<0.000000e+00> : vector<2x8xf32>
    %54 = vector.multi_reduction <add>, %53, %cst_25 [2] : vector<2x8x8xf32> to vector<2x8xf32>
    %55 = vector.shape_cast %54 : vector<2x8xf32> to vector<2x8x1xf32>
    %56 = vector.broadcast %55 : vector<2x8x1xf32> to vector<2x8x8xf32>
    %57 = arith.divf %53, %56 : vector<2x8x8xf32>
    "tpu.trace_start"() <{level = 10 : i32, message = "blm,bmd->bld"}> : () -> ()
    %cst_26 = arith.constant dense<0.000000e+00> : vector<2x8x8xf32>
    %58 = tpu.matmul %57, %47, %cst_26 {dimension_numbers = #tpu.dot_dimension_numbers<[2], [1], [1], [2], [0, 0, 0, 1, 1, 2], [0], [0]>} : vector<2x8x8xf32>, vector<2x8x8xf32>, vector<2x8x8xf32> -> vector<2x8x8xf32>
    "tpu.trace_stop"() : () -> ()
    %59 = vector.shape_cast %58 : vector<2x8x8xf32> to vector<16x8xf32>
    %60 = vector.extract_strided_slice %19 {offsets = [8, 0], sizes = [8, 32], strides = [1, 1]} : vector<32x32xf32> to vector<8x32xf32>
    %cst_27 = arith.constant dense<0.000000e+00> : vector<16x32xf32>
    %61 = tpu.matmul %59, %60, %cst_27 {dimension_numbers = #tpu.dot_dimension_numbers<[1], [0], [0], [1], [0, 0, 1, 1], [], []>} : vector<16x8xf32>, vector<8x32xf32>, vector<16x32xf32> -> vector<16x32xf32>
    %62 = arith.addf %41, %61 : vector<16x32xf32>
    %63 = vector.extract_strided_slice %13 {offsets = [0, 16], sizes = [16, 8], strides = [1, 1]} : vector<16x32xf32> to vector<16x8xf32>
    %64 = vector.shape_cast %63 : vector<16x8xf32> to vector<2x8x8xf32>
    %65 = vector.extract_strided_slice %14 {offsets = [0, 16], sizes = [16, 8], strides = [1, 1]} : vector<16x32xf32> to vector<16x8xf32>
    %66 = vector.shape_cast %65 : vector<16x8xf32> to vector<2x8x8xf32>
    %67 = vector.extract_strided_slice %15 {offsets = [0, 16], sizes = [16, 8], strides = [1, 1]} : vector<16x32xf32> to vector<16x8xf32>
    %68 = vector.shape_cast %67 : vector<16x8xf32> to vector<2x8x8xf32>
    "tpu.trace_start"() <{level = 10 : i32, message = "bld,bmd->blm"}> : () -> ()
    %cst_28 = arith.constant dense<0.000000e+00> : vector<2x8x8xf32>
    %69 = tpu.matmul %64, %66, %cst_28 {dimension_numbers = #tpu.dot_dimension_numbers<[2], [2], [1], [1], [0, 0, 0, 1, 1, 1], [0], [0]>} : vector<2x8x8xf32>, vector<2x8x8xf32>, vector<2x8x8xf32> -> vector<2x8x8xf32>
    "tpu.trace_stop"() : () -> ()
    %cst_29 = arith.constant dense<0xFF800000> : vector<2x8xf32>
    %70 = vector.multi_reduction <maximumf>, %69, %cst_29 [2] : vector<2x8x8xf32> to vector<2x8xf32>
    %71 = vector.shape_cast %70 : vector<2x8xf32> to vector<2x8x1xf32>
    %72 = vector.broadcast %71 : vector<2x8x1xf32> to vector<2x8x8xf32>
    %73 = arith.subf %69, %72 : vector<2x8x8xf32>
    %74 = math.exp %73 : vector<2x8x8xf32>
    %cst_30 = arith.constant dense<0.000000e+00> : vector<2x8xf32>
    %75 = vector.multi_reduction <add>, %74, %cst_30 [2] : vector<2x8x8xf32> to vector<2x8xf32>
    %76 = vector.shape_cast %75 : vector<2x8xf32> to vector<2x8x1xf32>
    %77 = vector.broadcast %76 : vector<2x8x1xf32> to vector<2x8x8xf32>
    %78 = arith.divf %74, %77 : vector<2x8x8xf32>
    "tpu.trace_start"() <{level = 10 : i32, message = "blm,bmd->bld"}> : () -> ()
    %cst_31 = arith.constant dense<0.000000e+00> : vector<2x8x8xf32>
    %79 = tpu.matmul %78, %68, %cst_31 {dimension_numbers = #tpu.dot_dimension_numbers<[2], [1], [1], [2], [0, 0, 0, 1, 1, 2], [0], [0]>} : vector<2x8x8xf32>, vector<2x8x8xf32>, vector<2x8x8xf32> -> vector<2x8x8xf32>
    "tpu.trace_stop"() : () -> ()
    %80 = vector.shape_cast %79 : vector<2x8x8xf32> to vector<16x8xf32>
    %81 = vector.extract_strided_slice %19 {offsets = [16, 0], sizes = [8, 32], strides = [1, 1]} : vector<32x32xf32> to vector<8x32xf32>
    %cst_32 = arith.constant dense<0.000000e+00> : vector<16x32xf32>
    %82 = tpu.matmul %80, %81, %cst_32 {dimension_numbers = #tpu.dot_dimension_numbers<[1], [0], [0], [1], [0, 0, 1, 1], [], []>} : vector<16x8xf32>, vector<8x32xf32>, vector<16x32xf32> -> vector<16x32xf32>
    %83 = arith.addf %62, %82 : vector<16x32xf32>
    %84 = vector.extract_strided_slice %13 {offsets = [0, 24], sizes = [16, 8], strides = [1, 1]} : vector<16x32xf32> to vector<16x8xf32>
    %85 = vector.shape_cast %84 : vector<16x8xf32> to vector<2x8x8xf32>
    %86 = vector.extract_strided_slice %14 {offsets = [0, 24], sizes = [16, 8], strides = [1, 1]} : vector<16x32xf32> to vector<16x8xf32>
    %87 = vector.shape_cast %86 : vector<16x8xf32> to vector<2x8x8xf32>
    %88 = vector.extract_strided_slice %15 {offsets = [0, 24], sizes = [16, 8], strides = [1, 1]} : vector<16x32xf32> to vector<16x8xf32>
    %89 = vector.shape_cast %88 : vector<16x8xf32> to vector<2x8x8xf32>
    "tpu.trace_start"() <{level = 10 : i32, message = "bld,bmd->blm"}> : () -> ()
    %cst_33 = arith.constant dense<0.000000e+00> : vector<2x8x8xf32>
    %90 = tpu.matmul %85, %87, %cst_33 {dimension_numbers = #tpu.dot_dimension_numbers<[2], [2], [1], [1], [0, 0, 0, 1, 1, 1], [0], [0]>} : vector<2x8x8xf32>, vector<2x8x8xf32>, vector<2x8x8xf32> -> vector<2x8x8xf32>
    "tpu.trace_stop"() : () -> ()
    %cst_34 = arith.constant dense<0xFF800000> : vector<2x8xf32>
    %91 = vector.multi_reduction <maximumf>, %90, %cst_34 [2] : vector<2x8x8xf32> to vector<2x8xf32>
    %92 = vector.shape_cast %91 : vector<2x8xf32> to vector<2x8x1xf32>
    %93 = vector.broadcast %92 : vector<2x8x1xf32> to vector<2x8x8xf32>
    %94 = arith.subf %90, %93 : vector<2x8x8xf32>
    %95 = math.exp %94 : vector<2x8x8xf32>
    %cst_35 = arith.constant dense<0.000000e+00> : vector<2x8xf32>
    %96 = vector.multi_reduction <add>, %95, %cst_35 [2] : vector<2x8x8xf32> to vector<2x8xf32>
    %97 = vector.shape_cast %96 : vector<2x8xf32> to vector<2x8x1xf32>
    %98 = vector.broadcast %97 : vector<2x8x1xf32> to vector<2x8x8xf32>
    %99 = arith.divf %95, %98 : vector<2x8x8xf32>
    "tpu.trace_start"() <{level = 10 : i32, message = "blm,bmd->bld"}> : () -> ()
    %cst_36 = arith.constant dense<0.000000e+00> : vector<2x8x8xf32>
    %100 = tpu.matmul %99, %89, %cst_36 {dimension_numbers = #tpu.dot_dimension_numbers<[2], [1], [1], [2], [0, 0, 0, 1, 1, 2], [0], [0]>} : vector<2x8x8xf32>, vector<2x8x8xf32>, vector<2x8x8xf32> -> vector<2x8x8xf32>
    "tpu.trace_stop"() : () -> ()
    %101 = vector.shape_cast %100 : vector<2x8x8xf32> to vector<16x8xf32>
    %102 = vector.extract_strided_slice %19 {offsets = [24, 0], sizes = [8, 32], strides = [1, 1]} : vector<32x32xf32> to vector<8x32xf32>
    %cst_37 = arith.constant dense<0.000000e+00> : vector<16x32xf32>
    %103 = tpu.matmul %101, %102, %cst_37 {dimension_numbers = #tpu.dot_dimension_numbers<[1], [0], [0], [1], [0, 0, 1, 1], [], []>} : vector<16x8xf32>, vector<8x32xf32>, vector<16x32xf32> -> vector<16x32xf32>
    %104 = arith.addf %83, %103 : vector<16x32xf32>
    %105 = arith.addf %5, %104 : vector<16x32xf32>
    %c0_38 = arith.constant 0 : index
    %c0_39 = arith.constant 0 : index
    %c0_40 = arith.constant 0 : index
    %106 = vector.load %arg7[%c0_38, %c0_39, %c0_40] : memref<2x1x32xf32, #tpu.memory_space<vmem>>, vector<1x1x32xf32>
    %107 = vector.shape_cast %106 : vector<1x1x32xf32> to vector<1x32xf32>
    %c0_41 = arith.constant 0 : index
    %c0_42 = arith.constant 0 : index
    %c0_43 = arith.constant 0 : index
    %108 = vector.load %arg8[%c0_41, %c0_42, %c0_43] : memref<2x1x32xf32, #tpu.memory_space<vmem>>, vector<1x1x32xf32>
    %109 = vector.shape_cast %108 : vector<1x1x32xf32> to vector<1x32xf32>
    %cst_44 = arith.constant dense<0.000000e+00> : vector<16xf32>
    %110 = vector.multi_reduction <add>, %105, %cst_44 [1] : vector<16x32xf32> to vector<16xf32>
    %111 = vector.shape_cast %110 : vector<16xf32> to vector<16x1xf32>
    %cst_45 = arith.constant 3.200000e+01 : f32
    %112 = vector.broadcast %cst_45 : f32 to vector<16x1xf32>
    %113 = arith.divf %111, %112 : vector<16x1xf32>
    %114 = vector.broadcast %113 : vector<16x1xf32> to vector<16x32xf32>
    %115 = arith.subf %105, %114 : vector<16x32xf32>
    %116 = arith.mulf %115, %115 : vector<16x32xf32>
    %cst_46 = arith.constant dense<0.000000e+00> : vector<16xf32>
    %117 = vector.multi_reduction <add>, %116, %cst_46 [1] : vector<16x32xf32> to vector<16xf32>
    %118 = vector.shape_cast %117 : vector<16xf32> to vector<16x1xf32>
    %cst_47 = arith.constant 3.200000e+01 : f32
    %119 = vector.broadcast %cst_47 : f32 to vector<16x1xf32>
    %120 = arith.divf %118, %119 : vector<16x1xf32>
    %cst_48 = arith.constant 9.99999974E-6 : f32
    %121 = vector.broadcast %cst_48 : f32 to vector<16x1xf32>
    %122 = arith.addf %120, %121 : vector<16x1xf32>
    %123 = math.rsqrt %122 : vector<16x1xf32>
    %124 = vector.broadcast %123 : vector<16x1xf32> to vector<16x32xf32>
    %125 = arith.mulf %115, %124 : vector<16x32xf32>
    %126 = vector.broadcast %107 : vector<1x32xf32> to vector<16x32xf32>
    %127 = arith.mulf %125, %126 : vector<16x32xf32>
    %128 = vector.broadcast %109 : vector<1x32xf32> to vector<16x32xf32>
    %129 = arith.addf %127, %128 : vector<16x32xf32>
    %c0_49 = arith.constant 0 : index
    %c0_50 = arith.constant 0 : index
    %c0_51 = arith.constant 0 : index
    %130 = vector.load %arg9[%c0_49, %c0_50, %c0_51] : memref<2x32x32xf32, #tpu.memory_space<vmem>>, vector<1x32x32xf32>
    %131 = vector.shape_cast %130 : vector<1x32x32xf32> to vector<32x32xf32>
    %cst_52 = arith.constant dense<0.000000e+00> : vector<16x32xf32>
    %132 = tpu.matmul %129, %131, %cst_52 {dimension_numbers = #tpu.dot_dimension_numbers<[1], [0], [0], [1], [0, 0, 1, 1], [], []>} : vector<16x32xf32>, vector<32x32xf32>, vector<16x32xf32> -> vector<16x32xf32>
    %c0_53 = arith.constant 0 : index
    %c0_54 = arith.constant 0 : index
    %c0_55 = arith.constant 0 : index
    %133 = vector.load %arg10[%c0_53, %c0_54, %c0_55] : memref<2x1x32xf32, #tpu.memory_space<vmem>>, vector<1x1x32xf32>
    %134 = vector.shape_cast %133 : vector<1x1x32xf32> to vector<1x32xf32>
    %135 = vector.broadcast %134 : vector<1x32xf32> to vector<16x32xf32>
    %136 = arith.addf %132, %135 : vector<16x32xf32>
    %cst_56 = arith.constant 0.000000e+00 : f32
    %137 = vector.broadcast %cst_56 : f32 to vector<16x32xf32>
    %138 = arith.maximumf %136, %137 : vector<16x32xf32>
    %c0_57 = arith.constant 0 : index
    %c0_58 = arith.constant 0 : index
    %c0_59 = arith.constant 0 : index
    %139 = vector.load %arg11[%c0_57, %c0_58, %c0_59] : memref<2x32x32xf32, #tpu.memory_space<vmem>>, vector<1x32x32xf32>
    %140 = vector.shape_cast %139 : vector<1x32x32xf32> to vector<32x32xf32>
    %cst_60 = arith.constant dense<0.000000e+00> : vector<16x32xf32>
    %141 = tpu.matmul %138, %140, %cst_60 {dimension_numbers = #tpu.dot_dimension_numbers<[1], [0], [0], [1], [0, 0, 1, 1], [], []>} : vector<16x32xf32>, vector<32x32xf32>, vector<16x32xf32> -> vector<16x32xf32>
    %c0_61 = arith.constant 0 : index
    %c0_62 = arith.constant 0 : index
    %c0_63 = arith.constant 0 : index
    %142 = vector.load %arg12[%c0_61, %c0_62, %c0_63] : memref<2x1x32xf32, #tpu.memory_space<vmem>>, vector<1x1x32xf32>
    %143 = vector.shape_cast %142 : vector<1x1x32xf32> to vector<1x32xf32>
    %144 = vector.broadcast %143 : vector<1x32xf32> to vector<16x32xf32>
    %145 = arith.addf %141, %144 : vector<16x32xf32>
    %146 = arith.addf %129, %145 : vector<16x32xf32>
    %c0_64 = arith.constant 0 : index
    %c0_65 = arith.constant 0 : index
    %c0_66 = arith.constant 0 : index
    %147 = vector.load %arg13[%c0_64, %c0_65, %c0_66] : memref<2x1x32xf32, #tpu.memory_space<vmem>>, vector<1x1x32xf32>
    %148 = vector.shape_cast %147 : vector<1x1x32xf32> to vector<1x32xf32>
    %c0_67 = arith.constant 0 : index
    %c0_68 = arith.constant 0 : index
    %c0_69 = arith.constant 0 : index
    %149 = vector.load %arg14[%c0_67, %c0_68, %c0_69] : memref<2x1x32xf32, #tpu.memory_space<vmem>>, vector<1x1x32xf32>
    %150 = vector.shape_cast %149 : vector<1x1x32xf32> to vector<1x32xf32>
    %cst_70 = arith.constant dense<0.000000e+00> : vector<16xf32>
    %151 = vector.multi_reduction <add>, %146, %cst_70 [1] : vector<16x32xf32> to vector<16xf32>
    %152 = vector.shape_cast %151 : vector<16xf32> to vector<16x1xf32>
    %cst_71 = arith.constant 3.200000e+01 : f32
    %153 = vector.broadcast %cst_71 : f32 to vector<16x1xf32>
    %154 = arith.divf %152, %153 : vector<16x1xf32>
    %155 = vector.broadcast %154 : vector<16x1xf32> to vector<16x32xf32>
    %156 = arith.subf %146, %155 : vector<16x32xf32>
    %157 = arith.mulf %156, %156 : vector<16x32xf32>
    %cst_72 = arith.constant dense<0.000000e+00> : vector<16xf32>
    %158 = vector.multi_reduction <add>, %157, %cst_72 [1] : vector<16x32xf32> to vector<16xf32>
    %159 = vector.shape_cast %158 : vector<16xf32> to vector<16x1xf32>
    %cst_73 = arith.constant 3.200000e+01 : f32
    %160 = vector.broadcast %cst_73 : f32 to vector<16x1xf32>
    %161 = arith.divf %159, %160 : vector<16x1xf32>
    %cst_74 = arith.constant 9.99999974E-6 : f32
    %162 = vector.broadcast %cst_74 : f32 to vector<16x1xf32>
    %163 = arith.addf %161, %162 : vector<16x1xf32>
    %164 = math.rsqrt %163 : vector<16x1xf32>
    %165 = vector.broadcast %164 : vector<16x1xf32> to vector<16x32xf32>
    %166 = arith.mulf %156, %165 : vector<16x32xf32>
    %167 = vector.broadcast %148 : vector<1x32xf32> to vector<16x32xf32>
    %168 = arith.mulf %166, %167 : vector<16x32xf32>
    %169 = vector.broadcast %150 : vector<1x32xf32> to vector<16x32xf32>
    %170 = arith.addf %168, %169 : vector<16x32xf32>
    %c1 = arith.constant 1 : index
    %c0_75 = arith.constant 0 : index
    %c0_76 = arith.constant 0 : index
    %171 = vector.load %arg3[%c1, %c0_75, %c0_76] : memref<2x32x96xf32, #tpu.memory_space<vmem>>, vector<1x32x96xf32>
    %172 = vector.shape_cast %171 : vector<1x32x96xf32> to vector<32x96xf32>
    %cst_77 = arith.constant dense<0.000000e+00> : vector<16x96xf32>
    %173 = tpu.matmul %170, %172, %cst_77 {dimension_numbers = #tpu.dot_dimension_numbers<[1], [0], [0], [1], [0, 0, 1, 1], [], []>} : vector<16x32xf32>, vector<32x96xf32>, vector<16x96xf32> -> vector<16x96xf32>
    %c1_78 = arith.constant 1 : index
    %c0_79 = arith.constant 0 : index
    %c0_80 = arith.constant 0 : index
    %174 = vector.load %arg4[%c1_78, %c0_79, %c0_80] : memref<2x1x96xf32, #tpu.memory_space<vmem>>, vector<1x1x96xf32>
    %175 = vector.shape_cast %174 : vector<1x1x96xf32> to vector<1x96xf32>
    %176 = vector.broadcast %175 : vector<1x96xf32> to vector<16x96xf32>
    %177 = arith.addf %173, %176 : vector<16x96xf32>
    %178 = vector.extract_strided_slice %177 {offsets = [0, 0], sizes = [16, 32], strides = [1, 1]} : vector<16x96xf32> to vector<16x32xf32>
    %179 = vector.extract_strided_slice %177 {offsets = [0, 32], sizes = [16, 32], strides = [1, 1]} : vector<16x96xf32> to vector<16x32xf32>
    %180 = vector.extract_strided_slice %177 {offsets = [0, 64], sizes = [16, 32], strides = [1, 1]} : vector<16x96xf32> to vector<16x32xf32>
    %c1_81 = arith.constant 1 : index
    %c0_82 = arith.constant 0 : index
    %c0_83 = arith.constant 0 : index
    %181 = vector.load %arg6[%c1_81, %c0_82, %c0_83] : memref<2x1x32xf32, #tpu.memory_space<vmem>>, vector<1x1x32xf32>
    %182 = vector.shape_cast %181 : vector<1x1x32xf32> to vector<1x32xf32>
    %c1_84 = arith.constant 1 : index
    %c0_85 = arith.constant 0 : index
    %c0_86 = arith.constant 0 : index
    %183 = vector.load %arg5[%c1_84, %c0_85, %c0_86] : memref<2x32x32xf32, #tpu.memory_space<vmem>>, vector<1x32x32xf32>
    %184 = vector.shape_cast %183 : vector<1x32x32xf32> to vector<32x32xf32>
    %185 = vector.extract_strided_slice %178 {offsets = [0, 0], sizes = [16, 8], strides = [1, 1]} : vector<16x32xf32> to vector<16x8xf32>
    %186 = vector.shape_cast %185 : vector<16x8xf32> to vector<2x8x8xf32>
    %187 = vector.extract_strided_slice %179 {offsets = [0, 0], sizes = [16, 8], strides = [1, 1]} : vector<16x32xf32> to vector<16x8xf32>
    %188 = vector.shape_cast %187 : vector<16x8xf32> to vector<2x8x8xf32>
    %189 = vector.extract_strided_slice %180 {offsets = [0, 0], sizes = [16, 8], strides = [1, 1]} : vector<16x32xf32> to vector<16x8xf32>
    %190 = vector.shape_cast %189 : vector<16x8xf32> to vector<2x8x8xf32>
    "tpu.trace_start"() <{level = 10 : i32, message = "bld,bmd->blm"}> : () -> ()
    %cst_87 = arith.constant dense<0.000000e+00> : vector<2x8x8xf32>
    %191 = tpu.matmul %186, %188, %cst_87 {dimension_numbers = #tpu.dot_dimension_numbers<[2], [2], [1], [1], [0, 0, 0, 1, 1, 1], [0], [0]>} : vector<2x8x8xf32>, vector<2x8x8xf32>, vector<2x8x8xf32> -> vector<2x8x8xf32>
    "tpu.trace_stop"() : () -> ()
    %cst_88 = arith.constant dense<0xFF800000> : vector<2x8xf32>
    %192 = vector.multi_reduction <maximumf>, %191, %cst_88 [2] : vector<2x8x8xf32> to vector<2x8xf32>
    %193 = vector.shape_cast %192 : vector<2x8xf32> to vector<2x8x1xf32>
    %194 = vector.broadcast %193 : vector<2x8x1xf32> to vector<2x8x8xf32>
    %195 = arith.subf %191, %194 : vector<2x8x8xf32>
    %196 = math.exp %195 : vector<2x8x8xf32>
    %cst_89 = arith.constant dense<0.000000e+00> : vector<2x8xf32>
    %197 = vector.multi_reduction <add>, %196, %cst_89 [2] : vector<2x8x8xf32> to vector<2x8xf32>
    %198 = vector.shape_cast %197 : vector<2x8xf32> to vector<2x8x1xf32>
    %199 = vector.broadcast %198 : vector<2x8x1xf32> to vector<2x8x8xf32>
    %200 = arith.divf %196, %199 : vector<2x8x8xf32>
    "tpu.trace_start"() <{level = 10 : i32, message = "blm,bmd->bld"}> : () -> ()
    %cst_90 = arith.constant dense<0.000000e+00> : vector<2x8x8xf32>
    %201 = tpu.matmul %200, %190, %cst_90 {dimension_numbers = #tpu.dot_dimension_numbers<[2], [1], [1], [2], [0, 0, 0, 1, 1, 2], [0], [0]>} : vector<2x8x8xf32>, vector<2x8x8xf32>, vector<2x8x8xf32> -> vector<2x8x8xf32>
    "tpu.trace_stop"() : () -> ()
    %202 = vector.shape_cast %201 : vector<2x8x8xf32> to vector<16x8xf32>
    %203 = vector.extract_strided_slice %184 {offsets = [0, 0], sizes = [8, 32], strides = [1, 1]} : vector<32x32xf32> to vector<8x32xf32>
    %cst_91 = arith.constant dense<0.000000e+00> : vector<16x32xf32>
    %204 = tpu.matmul %202, %203, %cst_91 {dimension_numbers = #tpu.dot_dimension_numbers<[1], [0], [0], [1], [0, 0, 1, 1], [], []>} : vector<16x8xf32>, vector<8x32xf32>, vector<16x32xf32> -> vector<16x32xf32>
    %205 = vector.broadcast %182 : vector<1x32xf32> to vector<16x32xf32>
    %206 = arith.addf %205, %204 : vector<16x32xf32>
    %207 = vector.extract_strided_slice %178 {offsets = [0, 8], sizes = [16, 8], strides = [1, 1]} : vector<16x32xf32> to vector<16x8xf32>
    %208 = vector.shape_cast %207 : vector<16x8xf32> to vector<2x8x8xf32>
    %209 = vector.extract_strided_slice %179 {offsets = [0, 8], sizes = [16, 8], strides = [1, 1]} : vector<16x32xf32> to vector<16x8xf32>
    %210 = vector.shape_cast %209 : vector<16x8xf32> to vector<2x8x8xf32>
    %211 = vector.extract_strided_slice %180 {offsets = [0, 8], sizes = [16, 8], strides = [1, 1]} : vector<16x32xf32> to vector<16x8xf32>
    %212 = vector.shape_cast %211 : vector<16x8xf32> to vector<2x8x8xf32>
    "tpu.trace_start"() <{level = 10 : i32, message = "bld,bmd->blm"}> : () -> ()
    %cst_92 = arith.constant dense<0.000000e+00> : vector<2x8x8xf32>
    %213 = tpu.matmul %208, %210, %cst_92 {dimension_numbers = #tpu.dot_dimension_numbers<[2], [2], [1], [1], [0, 0, 0, 1, 1, 1], [0], [0]>} : vector<2x8x8xf32>, vector<2x8x8xf32>, vector<2x8x8xf32> -> vector<2x8x8xf32>
    "tpu.trace_stop"() : () -> ()
    %cst_93 = arith.constant dense<0xFF800000> : vector<2x8xf32>
    %214 = vector.multi_reduction <maximumf>, %213, %cst_93 [2] : vector<2x8x8xf32> to vector<2x8xf32>
    %215 = vector.shape_cast %214 : vector<2x8xf32> to vector<2x8x1xf32>
    %216 = vector.broadcast %215 : vector<2x8x1xf32> to vector<2x8x8xf32>
    %217 = arith.subf %213, %216 : vector<2x8x8xf32>
    %218 = math.exp %217 : vector<2x8x8xf32>
    %cst_94 = arith.constant dense<0.000000e+00> : vector<2x8xf32>
    %219 = vector.multi_reduction <add>, %218, %cst_94 [2] : vector<2x8x8xf32> to vector<2x8xf32>
    %220 = vector.shape_cast %219 : vector<2x8xf32> to vector<2x8x1xf32>
    %221 = vector.broadcast %220 : vector<2x8x1xf32> to vector<2x8x8xf32>
    %222 = arith.divf %218, %221 : vector<2x8x8xf32>
    "tpu.trace_start"() <{level = 10 : i32, message = "blm,bmd->bld"}> : () -> ()
    %cst_95 = arith.constant dense<0.000000e+00> : vector<2x8x8xf32>
    %223 = tpu.matmul %222, %212, %cst_95 {dimension_numbers = #tpu.dot_dimension_numbers<[2], [1], [1], [2], [0, 0, 0, 1, 1, 2], [0], [0]>} : vector<2x8x8xf32>, vector<2x8x8xf32>, vector<2x8x8xf32> -> vector<2x8x8xf32>
    "tpu.trace_stop"() : () -> ()
    %224 = vector.shape_cast %223 : vector<2x8x8xf32> to vector<16x8xf32>
    %225 = vector.extract_strided_slice %184 {offsets = [8, 0], sizes = [8, 32], strides = [1, 1]} : vector<32x32xf32> to vector<8x32xf32>
    %cst_96 = arith.constant dense<0.000000e+00> : vector<16x32xf32>
    %226 = tpu.matmul %224, %225, %cst_96 {dimension_numbers = #tpu.dot_dimension_numbers<[1], [0], [0], [1], [0, 0, 1, 1], [], []>} : vector<16x8xf32>, vector<8x32xf32>, vector<16x32xf32> -> vector<16x32xf32>
    %227 = arith.addf %206, %226 : vector<16x32xf32>
    %228 = vector.extract_strided_slice %178 {offsets = [0, 16], sizes = [16, 8], strides = [1, 1]} : vector<16x32xf32> to vector<16x8xf32>
    %229 = vector.shape_cast %228 : vector<16x8xf32> to vector<2x8x8xf32>
    %230 = vector.extract_strided_slice %179 {offsets = [0, 16], sizes = [16, 8], strides = [1, 1]} : vector<16x32xf32> to vector<16x8xf32>
    %231 = vector.shape_cast %230 : vector<16x8xf32> to vector<2x8x8xf32>
    %232 = vector.extract_strided_slice %180 {offsets = [0, 16], sizes = [16, 8], strides = [1, 1]} : vector<16x32xf32> to vector<16x8xf32>
    %233 = vector.shape_cast %232 : vector<16x8xf32> to vector<2x8x8xf32>
    "tpu.trace_start"() <{level = 10 : i32, message = "bld,bmd->blm"}> : () -> ()
    %cst_97 = arith.constant dense<0.000000e+00> : vector<2x8x8xf32>
    %234 = tpu.matmul %229, %231, %cst_97 {dimension_numbers = #tpu.dot_dimension_numbers<[2], [2], [1], [1], [0, 0, 0, 1, 1, 1], [0], [0]>} : vector<2x8x8xf32>, vector<2x8x8xf32>, vector<2x8x8xf32> -> vector<2x8x8xf32>
    "tpu.trace_stop"() : () -> ()
    %cst_98 = arith.constant dense<0xFF800000> : vector<2x8xf32>
    %235 = vector.multi_reduction <maximumf>, %234, %cst_98 [2] : vector<2x8x8xf32> to vector<2x8xf32>
    %236 = vector.shape_cast %235 : vector<2x8xf32> to vector<2x8x1xf32>
    %237 = vector.broadcast %236 : vector<2x8x1xf32> to vector<2x8x8xf32>
    %238 = arith.subf %234, %237 : vector<2x8x8xf32>
    %239 = math.exp %238 : vector<2x8x8xf32>
    %cst_99 = arith.constant dense<0.000000e+00> : vector<2x8xf32>
    %240 = vector.multi_reduction <add>, %239, %cst_99 [2] : vector<2x8x8xf32> to vector<2x8xf32>
    %241 = vector.shape_cast %240 : vector<2x8xf32> to vector<2x8x1xf32>
    %242 = vector.broadcast %241 : vector<2x8x1xf32> to vector<2x8x8xf32>
    %243 = arith.divf %239, %242 : vector<2x8x8xf32>
    "tpu.trace_start"() <{level = 10 : i32, message = "blm,bmd->bld"}> : () -> ()
    %cst_100 = arith.constant dense<0.000000e+00> : vector<2x8x8xf32>
    %244 = tpu.matmul %243, %233, %cst_100 {dimension_numbers = #tpu.dot_dimension_numbers<[2], [1], [1], [2], [0, 0, 0, 1, 1, 2], [0], [0]>} : vector<2x8x8xf32>, vector<2x8x8xf32>, vector<2x8x8xf32> -> vector<2x8x8xf32>
    "tpu.trace_stop"() : () -> ()
    %245 = vector.shape_cast %244 : vector<2x8x8xf32> to vector<16x8xf32>
    %246 = vector.extract_strided_slice %184 {offsets = [16, 0], sizes = [8, 32], strides = [1, 1]} : vector<32x32xf32> to vector<8x32xf32>
    %cst_101 = arith.constant dense<0.000000e+00> : vector<16x32xf32>
    %247 = tpu.matmul %245, %246, %cst_101 {dimension_numbers = #tpu.dot_dimension_numbers<[1], [0], [0], [1], [0, 0, 1, 1], [], []>} : vector<16x8xf32>, vector<8x32xf32>, vector<16x32xf32> -> vector<16x32xf32>
    %248 = arith.addf %227, %247 : vector<16x32xf32>
    %249 = vector.extract_strided_slice %178 {offsets = [0, 24], sizes = [16, 8], strides = [1, 1]} : vector<16x32xf32> to vector<16x8xf32>
    %250 = vector.shape_cast %249 : vector<16x8xf32> to vector<2x8x8xf32>
    %251 = vector.extract_strided_slice %179 {offsets = [0, 24], sizes = [16, 8], strides = [1, 1]} : vector<16x32xf32> to vector<16x8xf32>
    %252 = vector.shape_cast %251 : vector<16x8xf32> to vector<2x8x8xf32>
    %253 = vector.extract_strided_slice %180 {offsets = [0, 24], sizes = [16, 8], strides = [1, 1]} : vector<16x32xf32> to vector<16x8xf32>
    %254 = vector.shape_cast %253 : vector<16x8xf32> to vector<2x8x8xf32>
    "tpu.trace_start"() <{level = 10 : i32, message = "bld,bmd->blm"}> : () -> ()
    %cst_102 = arith.constant dense<0.000000e+00> : vector<2x8x8xf32>
    %255 = tpu.matmul %250, %252, %cst_102 {dimension_numbers = #tpu.dot_dimension_numbers<[2], [2], [1], [1], [0, 0, 0, 1, 1, 1], [0], [0]>} : vector<2x8x8xf32>, vector<2x8x8xf32>, vector<2x8x8xf32> -> vector<2x8x8xf32>
    "tpu.trace_stop"() : () -> ()
    %cst_103 = arith.constant dense<0xFF800000> : vector<2x8xf32>
    %256 = vector.multi_reduction <maximumf>, %255, %cst_103 [2] : vector<2x8x8xf32> to vector<2x8xf32>
    %257 = vector.shape_cast %256 : vector<2x8xf32> to vector<2x8x1xf32>
    %258 = vector.broadcast %257 : vector<2x8x1xf32> to vector<2x8x8xf32>
    %259 = arith.subf %255, %258 : vector<2x8x8xf32>
    %260 = math.exp %259 : vector<2x8x8xf32>
    %cst_104 = arith.constant dense<0.000000e+00> : vector<2x8xf32>
    %261 = vector.multi_reduction <add>, %260, %cst_104 [2] : vector<2x8x8xf32> to vector<2x8xf32>
    %262 = vector.shape_cast %261 : vector<2x8xf32> to vector<2x8x1xf32>
    %263 = vector.broadcast %262 : vector<2x8x1xf32> to vector<2x8x8xf32>
    %264 = arith.divf %260, %263 : vector<2x8x8xf32>
    "tpu.trace_start"() <{level = 10 : i32, message = "blm,bmd->bld"}> : () -> ()
    %cst_105 = arith.constant dense<0.000000e+00> : vector<2x8x8xf32>
    %265 = tpu.matmul %264, %254, %cst_105 {dimension_numbers = #tpu.dot_dimension_numbers<[2], [1], [1], [2], [0, 0, 0, 1, 1, 2], [0], [0]>} : vector<2x8x8xf32>, vector<2x8x8xf32>, vector<2x8x8xf32> -> vector<2x8x8xf32>
    "tpu.trace_stop"() : () -> ()
    %266 = vector.shape_cast %265 : vector<2x8x8xf32> to vector<16x8xf32>
    %267 = vector.extract_strided_slice %184 {offsets = [24, 0], sizes = [8, 32], strides = [1, 1]} : vector<32x32xf32> to vector<8x32xf32>
    %cst_106 = arith.constant dense<0.000000e+00> : vector<16x32xf32>
    %268 = tpu.matmul %266, %267, %cst_106 {dimension_numbers = #tpu.dot_dimension_numbers<[1], [0], [0], [1], [0, 0, 1, 1], [], []>} : vector<16x8xf32>, vector<8x32xf32>, vector<16x32xf32> -> vector<16x32xf32>
    %269 = arith.addf %248, %268 : vector<16x32xf32>
    %270 = arith.addf %170, %269 : vector<16x32xf32>
    %c1_107 = arith.constant 1 : index
    %c0_108 = arith.constant 0 : index
    %c0_109 = arith.constant 0 : index
    %271 = vector.load %arg7[%c1_107, %c0_108, %c0_109] : memref<2x1x32xf32, #tpu.memory_space<vmem>>, vector<1x1x32xf32>
    %272 = vector.shape_cast %271 : vector<1x1x32xf32> to vector<1x32xf32>
    %c1_110 = arith.constant 1 : index
    %c0_111 = arith.constant 0 : index
    %c0_112 = arith.constant 0 : index
    %273 = vector.load %arg8[%c1_110, %c0_111, %c0_112] : memref<2x1x32xf32, #tpu.memory_space<vmem>>, vector<1x1x32xf32>
    %274 = vector.shape_cast %273 : vector<1x1x32xf32> to vector<1x32xf32>
    %cst_113 = arith.constant dense<0.000000e+00> : vector<16xf32>
    %275 = vector.multi_reduction <add>, %270, %cst_113 [1] : vector<16x32xf32> to vector<16xf32>
    %276 = vector.shape_cast %275 : vector<16xf32> to vector<16x1xf32>
    %cst_114 = arith.constant 3.200000e+01 : f32
    %277 = vector.broadcast %cst_114 : f32 to vector<16x1xf32>
    %278 = arith.divf %276, %277 : vector<16x1xf32>
    %279 = vector.broadcast %278 : vector<16x1xf32> to vector<16x32xf32>
    %280 = arith.subf %270, %279 : vector<16x32xf32>
    %281 = arith.mulf %280, %280 : vector<16x32xf32>
    %cst_115 = arith.constant dense<0.000000e+00> : vector<16xf32>
    %282 = vector.multi_reduction <add>, %281, %cst_115 [1] : vector<16x32xf32> to vector<16xf32>
    %283 = vector.shape_cast %282 : vector<16xf32> to vector<16x1xf32>
    %cst_116 = arith.constant 3.200000e+01 : f32
    %284 = vector.broadcast %cst_116 : f32 to vector<16x1xf32>
    %285 = arith.divf %283, %284 : vector<16x1xf32>
    %cst_117 = arith.constant 9.99999974E-6 : f32
    %286 = vector.broadcast %cst_117 : f32 to vector<16x1xf32>
    %287 = arith.addf %285, %286 : vector<16x1xf32>
    %288 = math.rsqrt %287 : vector<16x1xf32>
    %289 = vector.broadcast %288 : vector<16x1xf32> to vector<16x32xf32>
    %290 = arith.mulf %280, %289 : vector<16x32xf32>
    %291 = vector.broadcast %272 : vector<1x32xf32> to vector<16x32xf32>
    %292 = arith.mulf %290, %291 : vector<16x32xf32>
    %293 = vector.broadcast %274 : vector<1x32xf32> to vector<16x32xf32>
    %294 = arith.addf %292, %293 : vector<16x32xf32>
    %c1_118 = arith.constant 1 : index
    %c0_119 = arith.constant 0 : index
    %c0_120 = arith.constant 0 : index
    %295 = vector.load %arg9[%c1_118, %c0_119, %c0_120] : memref<2x32x32xf32, #tpu.memory_space<vmem>>, vector<1x32x32xf32>
    %296 = vector.shape_cast %295 : vector<1x32x32xf32> to vector<32x32xf32>
    %cst_121 = arith.constant dense<0.000000e+00> : vector<16x32xf32>
    %297 = tpu.matmul %294, %296, %cst_121 {dimension_numbers = #tpu.dot_dimension_numbers<[1], [0], [0], [1], [0, 0, 1, 1], [], []>} : vector<16x32xf32>, vector<32x32xf32>, vector<16x32xf32> -> vector<16x32xf32>
    %c1_122 = arith.constant 1 : index
    %c0_123 = arith.constant 0 : index
    %c0_124 = arith.constant 0 : index
    %298 = vector.load %arg10[%c1_122, %c0_123, %c0_124] : memref<2x1x32xf32, #tpu.memory_space<vmem>>, vector<1x1x32xf32>
    %299 = vector.shape_cast %298 : vector<1x1x32xf32> to vector<1x32xf32>
    %300 = vector.broadcast %299 : vector<1x32xf32> to vector<16x32xf32>
    %301 = arith.addf %297, %300 : vector<16x32xf32>
    %cst_125 = arith.constant 0.000000e+00 : f32
    %302 = vector.broadcast %cst_125 : f32 to vector<16x32xf32>
    %303 = arith.maximumf %301, %302 : vector<16x32xf32>
    %c1_126 = arith.constant 1 : index
    %c0_127 = arith.constant 0 : index
    %c0_128 = arith.constant 0 : index
    %304 = vector.load %arg11[%c1_126, %c0_127, %c0_128] : memref<2x32x32xf32, #tpu.memory_space<vmem>>, vector<1x32x32xf32>
    %305 = vector.shape_cast %304 : vector<1x32x32xf32> to vector<32x32xf32>
    %cst_129 = arith.constant dense<0.000000e+00> : vector<16x32xf32>
    %306 = tpu.matmul %303, %305, %cst_129 {dimension_numbers = #tpu.dot_dimension_numbers<[1], [0], [0], [1], [0, 0, 1, 1], [], []>} : vector<16x32xf32>, vector<32x32xf32>, vector<16x32xf32> -> vector<16x32xf32>
    %c1_130 = arith.constant 1 : index
    %c0_131 = arith.constant 0 : index
    %c0_132 = arith.constant 0 : index
    %307 = vector.load %arg12[%c1_130, %c0_131, %c0_132] : memref<2x1x32xf32, #tpu.memory_space<vmem>>, vector<1x1x32xf32>
    %308 = vector.shape_cast %307 : vector<1x1x32xf32> to vector<1x32xf32>
    %309 = vector.broadcast %308 : vector<1x32xf32> to vector<16x32xf32>
    %310 = arith.addf %306, %309 : vector<16x32xf32>
    %311 = arith.addf %294, %310 : vector<16x32xf32>
    %c1_133 = arith.constant 1 : index
    %c0_134 = arith.constant 0 : index
    %c0_135 = arith.constant 0 : index
    %312 = vector.load %arg13[%c1_133, %c0_134, %c0_135] : memref<2x1x32xf32, #tpu.memory_space<vmem>>, vector<1x1x32xf32>
    %313 = vector.shape_cast %312 : vector<1x1x32xf32> to vector<1x32xf32>
    %c1_136 = arith.constant 1 : index
    %c0_137 = arith.constant 0 : index
    %c0_138 = arith.constant 0 : index
    %314 = vector.load %arg14[%c1_136, %c0_137, %c0_138] : memref<2x1x32xf32, #tpu.memory_space<vmem>>, vector<1x1x32xf32>
    %315 = vector.shape_cast %314 : vector<1x1x32xf32> to vector<1x32xf32>
    %cst_139 = arith.constant dense<0.000000e+00> : vector<16xf32>
    %316 = vector.multi_reduction <add>, %311, %cst_139 [1] : vector<16x32xf32> to vector<16xf32>
    %317 = vector.shape_cast %316 : vector<16xf32> to vector<16x1xf32>
    %cst_140 = arith.constant 3.200000e+01 : f32
    %318 = vector.broadcast %cst_140 : f32 to vector<16x1xf32>
    %319 = arith.divf %317, %318 : vector<16x1xf32>
    %320 = vector.broadcast %319 : vector<16x1xf32> to vector<16x32xf32>
    %321 = arith.subf %311, %320 : vector<16x32xf32>
    %322 = arith.mulf %321, %321 : vector<16x32xf32>
    %cst_141 = arith.constant dense<0.000000e+00> : vector<16xf32>
    %323 = vector.multi_reduction <add>, %322, %cst_141 [1] : vector<16x32xf32> to vector<16xf32>
    %324 = vector.shape_cast %323 : vector<16xf32> to vector<16x1xf32>
    %cst_142 = arith.constant 3.200000e+01 : f32
    %325 = vector.broadcast %cst_142 : f32 to vector<16x1xf32>
    %326 = arith.divf %324, %325 : vector<16x1xf32>
    %cst_143 = arith.constant 9.99999974E-6 : f32
    %327 = vector.broadcast %cst_143 : f32 to vector<16x1xf32>
    %328 = arith.addf %326, %327 : vector<16x1xf32>
    %329 = math.rsqrt %328 : vector<16x1xf32>
    %330 = vector.broadcast %329 : vector<16x1xf32> to vector<16x32xf32>
    %331 = arith.mulf %321, %330 : vector<16x32xf32>
    %332 = vector.broadcast %313 : vector<1x32xf32> to vector<16x32xf32>
    %333 = arith.mulf %331, %332 : vector<16x32xf32>
    %334 = vector.broadcast %315 : vector<1x32xf32> to vector<16x32xf32>
    %335 = arith.addf %333, %334 : vector<16x32xf32>
    %336 = vector.extract_strided_slice %335 {offsets = [0, 0], sizes = [8, 32], strides = [1, 1]} : vector<16x32xf32> to vector<8x32xf32>
    %337 = vector.extract_strided_slice %335 {offsets = [8, 0], sizes = [8, 32], strides = [1, 1]} : vector<16x32xf32> to vector<8x32xf32>
    %338 = arith.addf %336, %337 : vector<8x32xf32>
    %cst_144 = arith.constant 5.000000e-01 : f32
    %339 = vector.broadcast %cst_144 : f32 to vector<8x32xf32>
    %340 = arith.mulf %338, %339 : vector<8x32xf32>
    %c0_145 = arith.constant 0 : index
    %c0_146 = arith.constant 0 : index
    %341 = vector.load %arg15[%c0_145, %c0_146] : memref<32x128xf32, #tpu.memory_space<vmem>>, vector<32x128xf32>
    %cst_147 = arith.constant dense<0.000000e+00> : vector<8x128xf32>
    %342 = tpu.matmul %340, %341, %cst_147 {dimension_numbers = #tpu.dot_dimension_numbers<[1], [0], [0], [1], [0, 0, 1, 1], [], []>} : vector<8x32xf32>, vector<32x128xf32>, vector<8x128xf32> -> vector<8x128xf32>
    %c0_148 = arith.constant 0 : index
    %c0_149 = arith.constant 0 : index
    %343 = vector.load %arg16[%c0_148, %c0_149] : memref<1x128xf32, #tpu.memory_space<vmem>>, vector<1x128xf32>
    %344 = vector.broadcast %343 : vector<1x128xf32> to vector<8x128xf32>
    %345 = arith.addf %342, %344 : vector<8x128xf32>
    %346 = arith.negf %345 : vector<8x128xf32>
    %347 = math.exp %346 : vector<8x128xf32>
    %cst_150 = arith.constant 1.000000e+00 : f32
    %348 = vector.broadcast %cst_150 : f32 to vector<8x128xf32>
    %349 = arith.addf %348, %347 : vector<8x128xf32>
    %350 = arith.divf %348, %349 : vector<8x128xf32>
    %c0_151 = arith.constant 0 : index
    %c0_152 = arith.constant 0 : index
    %351 = vector.load %arg17[%c0_151, %c0_152] : memref<8x128xf32, #tpu.memory_space<vmem>>, vector<8x128xf32>
    tpu.vector_store %arg17[%c0_151, %c0_152], %350 {strides = array<i32>} : memref<8x128xf32, #tpu.memory_space<vmem>>, vector<8x128xf32>,
    return
  }
}

</mosaic_0001>

<bundles_post_ra>
// kernel: tpu_custom_call.1
= control target key start
LH: loop header
LB: loop body
LE: loop exit
PB: predicated region body
PF: predicated region fallthrough
CT: control target
= control target key end

     0   :  { %s5940_s0 = inlined_call_operand.hbm [shape: f32[16,20], index: 0, kind: input, shape index: {}]   ;;  %s5941_s1 = inlined_call_operand.hbm [shape: f32[20,32], index: 1, kind: input, shape index: {}]   ;;  %s5942_s2 = inlined_call_operand.vmem [shape: f32[1,32], index: 2, kind: input, shape index: {}]   ;;  %s5943_s3 = inlined_call_operand.hbm [shape: f32[2,32,96], index: 3, kind: input, shape index: {}]   ;;  %s5944_s4 = inlined_call_operand.vmem [shape: f32[2,1,96], index: 4, kind: input, shape index: {}]   ;;  %s5945_s5 = inlined_call_operand.hbm [shape: f32[2,32,32], index: 5, kind: input, shape index: {}]   ;;  %s5946_s6 = inlined_call_operand.vmem [shape: f32[2,1,32], index: 6, kind: input, shape index: {}]   ;;  %s5947_s7 = inlined_call_operand.vmem [shape: f32[2,1,32], index: 7, kind: input, shape index: {}]   ;;  %s5948_s8 = inlined_call_operand.vmem [shape: f32[2,1,32], index: 8, kind: input, shape index: {}]   ;;  %s5949_s9 = inlined_call_operand.hbm [shape: f32[2,32,32], index: 9, kind: input, shape index: {}]   ;;  %s5950_s10 = inlined_call_operand.vmem [shape: f32[2,1,32], index: 10, kind: input, shape index: {}]   ;;  %s5951_s11 = inlined_call_operand.hbm [shape: f32[2,32,32], index: 11, kind: input, shape index: {}]   ;;  %s5952_s12 = inlined_call_operand.vmem [shape: f32[2,1,32], index: 12, kind: input, shape index: {}]   ;;  %s5953_s13 = inlined_call_operand.vmem [shape: f32[2,1,32], index: 13, kind: input, shape index: {}]   ;;  %s5954_s14 = inlined_call_operand.vmem [shape: f32[2,1,32], index: 14, kind: input, shape index: {}]   ;;  %s5955_s15 = inlined_call_operand.vmem [shape: f32[32,128], index: 15, kind: input, shape index: {}]   ;;  %s5956_s16 = inlined_call_operand.vmem [shape: f32[1,128], index: 16, kind: input, shape index: {}]   ;;  %s5957_s17 = inlined_call_operand.hbm [shape: f32[8,128], index: 17, kind: output, shape index: {}]  }
   0x1   :  { %5961 = sst [smem:[#allocation19_spill]] %s5940_s0 }
   0x2   :  { %5962 = sst [smem:[#allocation20_spill]] %s5941_s1 }
   0x3   :  { %5963 = sst [smem:[#allocation21_spill]] %s5956_s16 }
   0x4   :  { %5964 = sst [smem:[#allocation22_spill]] %s5957_s17 }
   0x5   :  { %22 = vsyncpa [#allocation3], 0 }
   0x6   :  { %23 = vsyncpa [#allocation6], 0 }
   0x7   :  { %24 = vsyncpa [#allocation9], 0 }
   0x8   :  { %25 = vsyncpa [#allocation12], 0 }
   0x9   :  { %26 = vsyncpa [#allocation4], 0  ;;  %s5297_s24 = smov [#allocation5]   ;;  %s5298_s26 = smov [#allocation8]  }
   0xa   :  { %s44_s25 = sshll.u32 %s5297_s24, 4  ;;  %s72_s27 = sshll.u32 %s5298_s26, 4  ;;  %s45_s25 = int_to_ptr.vmem [resolvable:$true] %s44_s25  ;;  %s5410_s27 = int_to_ptr.vmem [resolvable:$true] %s72_s27 }
   0xb   :  { %s5965_s0 = sld [smem:[#allocation20_spill]] }
  0x11   :  { %s5133_s30 = scalar_lea.hbm %s5965_s0, 384 }
  0x12   :  { %p5134_p0 = scmp.ne.s32.totalorder %s5965_s0, %s5133_s30  ;;  %p5137_p1 = scmp.lt.u32.totalorder %s5133_s30, %s5965_s0 }
  0x14   :  { %p5139_p2 = pnand %p5137_p1, %p5134_p0 }
  0x16   :  { %5142 = shalt.err (!%p5139_p2)
}
  0x17   :  { %s5143_s21 = scalar_lea.vmem %s45_s25, 384  ;;  %p5148_p4 = scmp.lt.s32.totalorder %s45_s25, %s45_s25 }
  0x18   :  { %p5144_p3 = scmp.ne.s32.totalorder %s45_s25, %s5143_s21  ;;  %p5149_p5 = scmp.lt.s32.totalorder %s5143_s21, %s5143_s21 }
  0x1a   :  { %p5150_p6 = por %p5149_p5, %p5148_p4 }
  0x1c   :  { %p5151_p7 = pnand %p5150_p6, %p5144_p3 }
  0x1e   :  { %5154 = shalt.err (!%p5151_p7)
}
  0x1f   :  { %s5299_s22 = smov 128   ;;  %s5300_s23 = smov 8  }
  0x20   :  { %50 = dma.hbm_to_vmem [thread:$0]  %s5965_s0, 384, %s45_s25, [#allocation6], %s5299_s22, %s5299_s22, %s5300_s23  }
  0x21   :  { %s5155_s30 = scalar_lea.hbm %s5945_s5, 1024 }
  0x22   :  { %p5156_p8 = scmp.ne.s32.totalorder %s5945_s5, %s5155_s30  ;;  %p5159_p9 = scmp.lt.u32.totalorder %s5155_s30, %s5945_s5 }
  0x24   :  { %p5161_p10 = pnand %p5159_p9, %p5156_p8 }
  0x26   :  { %5164 = shalt.err (!%p5161_p10)
}
  0x27   :  { %s5165_s21 = scalar_lea.vmem %s5410_s27, 1024  ;;  %p5170_p12 = scmp.lt.s32.totalorder %s5410_s27, %s5410_s27 }
  0x28   :  { %p5166_p11 = scmp.ne.s32.totalorder %s5410_s27, %s5165_s21  ;;  %p5171_p13 = scmp.lt.s32.totalorder %s5165_s21, %s5165_s21 }
  0x2a   :  { %p5172_p0 = por %p5171_p13, %p5170_p12 }
  0x2c   :  { %p5173_p1 = pnand %p5172_p0, %p5166_p11 }
  0x2e   :  { %5176 = shalt.err (!%p5173_p1)
}
  0x2f   :  { %78 = dma.hbm_to_vmem [thread:$0]  %s5945_s5, 1024, %s5410_s27, [#allocation9], %s5299_s22, %s5299_s22, %s5300_s23  }
  0x30   :  { %s5301_s24 = smov [#allocation2]   ;;  %s5302_s28 = smov [#allocation7]  }
  0x31   :  { %s32_s26 = sshll.u32 %s5301_s24, 4  ;;  %s58_s29 = sshll.u32 %s5302_s28, 4  ;;  %s33_s26 = int_to_ptr.vmem [resolvable:$true] %s32_s26  ;;  %s5447_s29 = int_to_ptr.vmem [resolvable:$true] %s58_s29 }
  0x32   :  { %s5966_s19 = sld [smem:[#allocation19_spill]] }
  0x38   :  { %s5177_s1 = scalar_lea.hbm %s5966_s19, 256 }
  0x39   :  { %p5178_p2 = scmp.ne.s32.totalorder %s5966_s19, %s5177_s1  ;;  %p5181_p3 = scmp.lt.u32.totalorder %s5177_s1, %s5966_s19 }
  0x3b   :  { %p5183_p4 = pnand %p5181_p3, %p5178_p2 }
  0x3d   :  { %5186 = shalt.err (!%p5183_p4)
}
  0x3e   :  { %s5187_s5 = scalar_lea.vmem %s33_s26, 256  ;;  %p5192_p6 = scmp.lt.s32.totalorder %s33_s26, %s33_s26 }
  0x3f   :  { %p5188_p5 = scmp.ne.s32.totalorder %s33_s26, %s5187_s5  ;;  %p5193_p7 = scmp.lt.s32.totalorder %s5187_s5, %s5187_s5 }
  0x41   :  { %p5194_p8 = por %p5193_p7, %p5192_p6 }
  0x43   :  { %p5195_p9 = pnand %p5194_p8, %p5188_p5 }
  0x45   :  { %5198 = shalt.err (!%p5195_p9)
}
  0x46   :  { %38 = dma.hbm_to_vmem [thread:$0]  %s5966_s19, 256, %s33_s26, [#allocation3], %s5299_s22, %s5299_s22, %s5300_s23  }
  0x47   :  { %s5199_s16 = scalar_lea.hbm %s5943_s3, 1024 }
  0x48   :  { %p5200_p10 = scmp.ne.s32.totalorder %s5943_s3, %s5199_s16  ;;  %p5203_p11 = scmp.lt.u32.totalorder %s5199_s16, %s5943_s3 }
  0x4a   :  { %p5205_p12 = pnand %p5203_p11, %p5200_p10 }
  0x4c   :  { %5208 = shalt.err (!%p5205_p12)
}
  0x4d   :  { %s5209_s1 = scalar_lea.vmem %s5447_s29, 1024  ;;  %p5214_p0 = scmp.lt.s32.totalorder %s5447_s29, %s5447_s29 }
  0x4e   :  { %p5210_p13 = scmp.ne.s32.totalorder %s5447_s29, %s5209_s1  ;;  %p5215_p1 = scmp.lt.s32.totalorder %s5209_s1, %s5209_s1 }
  0x50   :  { %p5216_p2 = por %p5215_p1, %p5214_p0 }
  0x52   :  { %p5217_p3 = pnand %p5216_p2, %p5210_p13 }
  0x54   :  { %5220 = shalt.err (!%p5217_p3)
}
  0x55   :  { %64 = dma.hbm_to_vmem [thread:$0]  %s5943_s3, 1024, %s5447_s29, [#allocation6], %s5299_s22, %s5299_s22, %s5300_s23  }
  0x56   :  { %s5303_s20 = smov [#allocation10]   ;;  %s5304_s5 = smov [#allocation11]  }
  0x57   :  { %s90_s21 = sshll.u32 %s5303_s20, 4  ;;  %s104_s27 = sshll.u32 %s5304_s5, 4  ;;  %s91_s21 = int_to_ptr.vmem [resolvable:$true] %s90_s21  ;;  %s5484_s27 = int_to_ptr.vmem [resolvable:$true] %s104_s27 }
  0x58   :  { %s5221_s24 = scalar_lea.hbm %s5949_s9, 1024 }
  0x59   :  { %p5222_p4 = scmp.ne.s32.totalorder %s5949_s9, %s5221_s24  ;;  %p5225_p5 = scmp.lt.u32.totalorder %s5221_s24, %s5949_s9 }
  0x5b   :  { %p5227_p6 = pnand %p5225_p5, %p5222_p4 }
  0x5d   :  { %5230 = shalt.err (!%p5227_p6)
}
  0x5e   :  { %s5231_s3 = scalar_lea.vmem %s91_s21, 1024  ;;  %p5236_p8 = scmp.lt.s32.totalorder %s91_s21, %s91_s21 }
  0x5f   :  { %p5232_p7 = scmp.ne.s32.totalorder %s91_s21, %s5231_s3  ;;  %p5237_p9 = scmp.lt.s32.totalorder %s5231_s3, %s5231_s3 }
  0x61   :  { %p5238_p10 = por %p5237_p9, %p5236_p8 }
  0x63   :  { %p5239_p11 = pnand %p5238_p10, %p5232_p7 }
  0x65   :  { %5242 = shalt.err (!%p5239_p11)
}
  0x66   :  { %96 = dma.hbm_to_vmem [thread:$0]  %s5949_s9, 1024, %s91_s21, [#allocation9], %s5299_s22, %s5299_s22, %s5300_s23  }
  0x67   :  { %s5243_s19 = scalar_lea.hbm %s5951_s11, 1024 }
  0x68   :  { %p5244_p12 = scmp.ne.s32.totalorder %s5951_s11, %s5243_s19  ;;  %p5247_p13 = scmp.lt.u32.totalorder %s5243_s19, %s5951_s11 }
  0x6a   :  { %p5249_p0 = pnand %p5247_p13, %p5244_p12 }
  0x6c   :  { %5252 = shalt.err (!%p5249_p0)
}
  0x6d   :  { %s5253_s24 = scalar_lea.vmem %s5484_s27, 1024  ;;  %p5258_p2 = scmp.lt.s32.totalorder %s5484_s27, %s5484_s27 }
  0x6e   :  { %p5254_p1 = scmp.ne.s32.totalorder %s5484_s27, %s5253_s24  ;;  %p5259_p3 = scmp.lt.s32.totalorder %s5253_s24, %s5253_s24 }
  0x70   :  { %p5260_p4 = por %p5259_p3, %p5258_p2 }
  0x72   :  { %p5261_p5 = pnand %p5260_p4, %p5254_p1 }
  0x74   :  { %5264 = shalt.err (!%p5261_p5)
}
  0x75   :  { %110 = dma.hbm_to_vmem [thread:$0]  %s5951_s11, 1024, %s5484_s27, [#allocation12], %s5299_s22, %s5299_s22, %s5300_s23  }
  0x76   :  { %5287 = dma.done.wait [#allocation3], 256  }
  0x77   :  { %5288 = vsyncadd [#allocation3], 4294967040 }
  0x78   :  { %5289 = dma.done.wait [#allocation6], 1408  }
  0x79   :  { %5290 = vsyncadd [#allocation6], 4294965888 }
  0x7a   :  { %5291 = dma.done.wait [#allocation9], 2048  }
  0x7b   :  { %5292 = vsyncadd [#allocation9], 4294965248 }
  0x7c   :  { %5293 = dma.done.wait [#allocation12], 1024  }
  0x7d   :  { %5294 = vsyncadd [#allocation12], 4294966272  ;;  %vm151_vm0 = vcmask 162816   ;;  %v141_v0 = vld [vmem:[#allocation5] sm:$0xff]  ;;  %v142_v1 = vld [vmem:[#allocation5 + $0x8] sm:$0xff]  ;;  %vm158_vm1 = vcmask 1043456  }
  0x7e   :  { %v4952_v2 = vpack.c.bf16 %v142_v1, %v141_v0  ;;  %v139_v3 = vld [vmem:[#allocation2] sm:$0xff]  ;;  %v237_v4 = vld [vmem:[#allocation7] sm:$0xff]  ;;  %v238_v6 = vld [vmem:[#allocation7 + $0x8] sm:$0xff]  ;;  %vm248_vm2 = vcmask 261120   ;;  %v5305_v17 = vmov 0.0   ;;  %vm5306_vm3 = vmmov 0  }
  0x7f   :  { %v143_v5 = vld [vmem:[#allocation5 + $0x10] sm:$0xf]  ;;  %4672 = vmatprep.mubr.msk.f32.mxu0 %vm151_vm0, %v139_v3  ;;  %v4956_v7 = vpack.c.bf16 %v238_v6, %v237_v4  ;;  %v140_v8 = vld [vmem:[#allocation2 + $0x8] sm:$0xff]  ;;  %v239_v9 = vld [vmem:[#allocation7 + $0x10] sm:$0xff]  ;;  %s5307_s27 = smov 96   ;;  %vm338_vm4 = vcmask 64512  }
  0x80   :  { %4953 = vmatprep.subr.bf16.mxu0 %v4952_v2  ;;  %v240_v10 = vld [vmem:[#allocation7 + $0x18] sm:$0xff]  ;;  %s5308_s16 = smov 64   ;;  %s5309_s17 = smov 88   ;;  %v331_v43 = vld [vmem:[#allocation8] sm:$0xff] }
  0x81   :  { %4955 = vmatpush3.bf16.msra.mxu0 %v4952_v2  ;;  %4957 = vmatprep.subr.bf16.mxu1 %v4956_v7  ;;  %v4960_v11 = vpack.c.bf16 %v240_v10, %v239_v9  ;;  %v4425_v12 = vld [vmem:[%s5942_s2] ss:$0 sm:$0xff]  ;;  %s5310_s28 = smov 120   ;;  %s5311_s30 = smov 56  }
  0x82   :  { %4670 = vmatprep.subr.msk.mxu0 %vm158_vm1, %v143_v5  ;;  %4959 = vmatpush3.bf16.msra.mxu1 %v4956_v7  ;;  %v4429_v18 = vld [vmem:[%s5944_s4] ss:$0 sm:$0xff]  ;;  %s5312_s3 = smov 112   ;;  %s5313_s29 = smov 80  }
  0x83   :  { %4961 = vmatprep.subr.bf16.mxu1 %v4960_v11  ;;  %s5314_s18 = smov 48   ;;  %s5315_s1 = smov 72  }
  0x84   :  { %s5316_s26 = smov 104   ;;  %s5317_s19 = smov 40  }
  0x85   :  { %4671 = vmatpush3.msk.msra.mxu0 %vm158_vm1, %v143_v5  ;;  %s5967_s20 = sld [smem:[#allocation21_spill]] }
  0x86   :  { %4673 = vmatmul.mubr.msk.f32.vlgmr.msra.gmra.mrb[0].mxu0 %vm151_vm0, %v140_v8  ;;  %4963 = vmatpush3.bf16.msra.mxu1 %v4960_v11 }
  0x87   :  { %4686 = vmatprep.subr.mxu0 %v5305_v17  ;;  %4691 = vmatprep.subr.mxu1 %v5305_v17 }
  0x88   :  { %4688 = vmatprep.mubr.msk.f32.mxu0 %vm5306_vm3, %v5305_v17 }
 0x159   :  { %v4674_v13 = vpop.f32.mrb[0].mxu0 }
 0x15a   :  { %v228_v14 = vpop.f32.mrb[1].mxu0  ;;  %v5528_v16 = vadd.f32 %v4674_v13, %v4425_v12 }
 0x15b   :  { %v5526_v15 = vadd.f32 %v4425_v12, %v228_v14 }
 0x15d   :  { %4683 = vmatprep.mubr.msk.f32.mxu1 %vm248_vm2, %v5526_v15 }
 0x15e   :  { %4684 = vmatmul.mubr.msk.f32.vlgmr.msra.gmra.mrb[0].mxu1 %vm248_vm2, %v5528_v16 }
 0x15f   :  { %4693 = vmatprep.mubr.msk.f32.mxu1 %vm5306_vm3, %v5305_v17 }
 0x231   :  { %v4685_v19 = vpop.f32.mrb[0].mxu1 }
 0x232   :  { %v321_v20 = vpop.f32.mrb[1].mxu1  ;;  %v5547_v22 = vadd.f32 %v4685_v19, %v4429_v18 }
 0x233   :  { %v5543_v21 = vadd.f32 %v4429_v18, %v321_v20 }
 0x235   :  { %336 = vrot.lane.b32.xlu0 %v5543_v21, %s5307_s27 }
 0x239   :  { %414 = vrot.lane.b32.xlu0 %v5547_v22, %s5307_s27 }
 0x2a7   :  { %v337_v23 = vpop.permute.xlu0 %336 }
 0x2a8   :  { %4687 = vmatpush3.xpose.msk.msra.mxu0 %vm338_vm4, %v337_v23 }
 0x2a9   :  { %4696 = vmatprep.subr.mxu0 %v5305_v17 }
 0x2ab   :  { %4689 = vmatmul.mubr.msk.f32.vlgmr.msra.gmra.mrb[2].mxu0 %vm338_vm4, %v5543_v21  ;;  %v415_v24 = vpop.permute.xlu0 %414 }
 0x2ac   :  { %4692 = vmatpush3.xpose.msk.msra.mxu1 %vm338_vm4, %v415_v24  ;;  %4698 = vmatprep.mubr.msk.f32.mxu0 %vm5306_vm3, %v5305_v17 }
 0x2ad   :  { %4701 = vmatprep.subr.mxu1 %v5305_v17 }
 0x2af   :  { %4694 = vmatmul.mubr.msk.f32.vlgmr.msra.gmra.mrb[2].mxu1 %vm338_vm4, %v5547_v22 }
 0x2b0   :  { %4703 = vmatprep.mubr.msk.f32.mxu1 %vm5306_vm3, %v5305_v17 }
 0x37e   :  { %v409_v25 = vpop.f32.mrb[2].mxu0 }
 0x37f   :  { %v4690_v26 = vpop.f32.mrb[3].mxu0  ;;  %v490_v27 = vsel %vm338_vm4, %v409_v25, -inf }
 0x380   :  { %491 = vmax.xlane.f32.xlu1 %v490_v27 }
 0x382   :  { %v486_v28 = vpop.f32.mrb[2].mxu1 }
 0x383   :  { %v4695_v29 = vpop.f32.mrb[3].mxu1  ;;  %v493_v30 = vsel %vm338_vm4, %v486_v28, -inf }
 0x384   :  { %494 = vmax.xlane.f32.xlu1 %v493_v30 }
 0x40d   :  { %v492_v31 = vpop.xlane.xlu1 %491 }
 0x40e   :  { %v496_v32 = vsub.f32 %v409_v25, %v492_v31 }
 0x410   :  { %v498_v33 = vmul.f32 1.442695, %v496_v32 }
 0x411   :  { %v495_v34 = vpop.xlane.xlu1 %494 }
 0x412   :  { %5049 = vpow2.f32 %v498_v33  ;;  %v497_v35 = vsub.f32 %v486_v28, %v495_v34 }
 0x414   :  { %v500_v36 = vmul.f32 1.442695, %v497_v35 }
 0x416   :  { %5051 = vpow2.f32 %v500_v36  ;;  %v332_v36 = vld [vmem:[#allocation8 + $0x8] sm:$0xff] }
 0x41c   :  { %v5050_v37 = vpop.eup %5049 }
 0x41d   :  { %v502_v38 = vsel %vm338_vm4, %v5050_v37, 0.0 }
 0x41e   :  { %503 = vadd.xlane.f32.xlu0 %v502_v38 }
 0x420   :  { %v5052_v39 = vpop.eup %5051 }
 0x421   :  { %v505_v40 = vsel %vm338_vm4, %v5052_v39, 0.0 }
 0x422   :  { %506 = vadd.xlane.f32.xlu1 %v505_v40 }
 0x433   :  { %512 = vrot.lane.b32.xlu1 %v5543_v21, %s5308_s16 }
 0x434   :  { %833 = vrot.lane.b32.xlu0 %v5547_v22, %s5309_s17 }
 0x437   :  { %588 = vrot.lane.b32.xlu1 %v5547_v22, %s5308_s16 }
 0x43b   :  { %755 = vrot.lane.b32.xlu1 %v5543_v21, %s5309_s17 }
 0x43f   :  { %753 = vrot.lane.b32.xlu1 %v5543_v21, %s5310_s28 }
 0x443   :  { %831 = vrot.lane.b32.xlu1 %v5547_v22, %s5310_s28 }
 0x4ab   :  { %v504_v41 = vpop.xlane.xlu0 %503 }
 0x4ac   :  { %5053 = vrcp.f32 %v504_v41 }
 0x4af   :  { %v507_v42 = vpop.xlane.xlu1 %506  ;;  %v834_v55 = vpop.permute.xlu0 %833 }
 0x4b0   :  { %5055 = vrcp.f32 %v507_v42 }
 0x4b3   :  { %v513_v44 = vpop.permute.xlu1 %512 }
 0x4b4   :  { %4697 = vmatpush3.msra.mxu0 %v513_v44 }
 0x4b5   :  { %4706 = vmatprep.subr.mxu0 %v331_v43 }
 0x4b6   :  { %v5054_v45 = vpop.eup %5053 }
 0x4b7   :  { %v509_v46 = vmul.f32 %v5054_v45, %v5050_v37  ;;  %v589_v47 = vpop.permute.xlu1 %588 }
 0x4b8   :  { %4702 = vmatpush3.msra.mxu1 %v589_v47 }
 0x4b9   :  { %4699 = vmatmul.mubr.msk.f32.vlgmr.msra.gmra.mrb[4].mxu0 %vm338_vm4, %v509_v46  ;;  %4711 = vmatprep.subr.mxu1 %v5305_v17 }
 0x4ba   :  { %v5056_v48 = vpop.eup %5055  ;;  %4707 = vmatpush3.msra.mxu0 %v331_v43 }
 0x4bb   :  { %v511_v49 = vmul.f32 %v5056_v48, %v5052_v39  ;;  %v756_v50 = vpop.permute.xlu1 %755  ;;  %4716 = vmatprep.subr.mxu0 %v5305_v17 }
 0x4bd   :  { %4704 = vmatmul.mubr.msk.f32.vlgmr.msra.gmra.mrb[4].mxu1 %vm338_vm4, %v511_v49 }
 0x4be   :  { %4713 = vmatprep.mubr.msk.f32.mxu1 %vm5306_vm3, %v5305_v17 }
 0x4bf   :  { %4712 = vmatpush3.xpose.msk.msra.mxu1 %vm338_vm4, %v756_v50  ;;  %v754_v51 = vpop.permute.xlu1 %753 }
 0x4c0   :  { %4721 = vmatprep.subr.mxu1 %v5305_v17 }
 0x4c2   :  { %4714 = vmatmul.mubr.msk.f32.vlgmr.msra.gmra.mrb[6].mxu1 %vm338_vm4, %v754_v51  ;;  %v333_v51 = vld [vmem:[#allocation8 + $0x10] sm:$0xff] }
 0x4c3   :  { %4723 = vmatprep.mubr.msk.f32.mxu1 %vm5306_vm3, %v5305_v17  ;;  %v832_v57 = vpop.permute.xlu1 %831 }
 0x58c   :  { %v584_v52 = vpop.f32.mrb[4].mxu0 }
 0x58d   :  { %v4700_v53 = vpop.f32.mrb[5].mxu0  ;;  %4708 = vmatprep.mubr.msk.f32.mxu0 %vm338_vm4, %v584_v52 }
 0x590   :  { %v660_v54 = vpop.f32.mrb[4].mxu1 }
 0x591   :  { %v4705_v56 = vpop.f32.mrb[5].mxu1  ;;  %4709 = vmatmul.mubr.msk.f32.vlgmr.msra.gmra.mrb[6].mxu0 %vm338_vm4, %v660_v54 }
 0x592   :  { %4717 = vmatpush3.xpose.msk.msra.mxu0 %vm338_vm4, %v834_v55  ;;  %4718 = vmatprep.mubr.msk.f32.mxu0 %vm5306_vm3, %v5305_v17 }
 0x593   :  { %4726 = vmatprep.subr.mxu0 %v5305_v17 }
 0x595   :  { %v827_v58 = vpop.f32.mrb[6].mxu1  ;;  %4719 = vmatmul.mubr.msk.f32.vlgmr.msra.gmra.mrb[8].mxu0 %vm338_vm4, %v832_v57 }
 0x596   :  { %v4715_v59 = vpop.f32.mrb[7].mxu1  ;;  %v909_v60 = vsel %vm338_vm4, %v827_v58, -inf  ;;  %4728 = vmatprep.mubr.msk.f32.mxu0 %vm5306_vm3, %v5305_v17 }
 0x597   :  { %910 = vmax.xlane.f32.xlu1 %v909_v60 }
 0x5a8   :  { %931 = vrot.lane.b32.xlu1 %v5543_v21, %s5311_s30 }
 0x5ac   :  { %1166 = vrot.lane.b32.xlu1 %v5543_v21, %s5312_s3 }
 0x5b0   :  { %1246 = vrot.lane.b32.xlu1 %v5547_v22, %s5313_s29 }
 0x5b4   :  { %1244 = vrot.lane.b32.xlu1 %v5547_v22, %s5312_s3 }
 0x624   :  { %v911_v61 = vpop.xlane.xlu1 %910 }
 0x625   :  { %v915_v62 = vsub.f32 %v827_v58, %v911_v61 }
 0x627   :  { %v917_v63 = vmul.f32 1.442695, %v915_v62 }
 0x628   :  { %v932_v0 = vpop.permute.xlu1 %931 }
 0x629   :  { %5057 = vpow2.f32 %v917_v63  ;;  %4722 = vmatpush3.msra.mxu1 %v932_v0 }
 0x62a   :  { %4736 = vmatprep.subr.mxu1 %v5305_v17 }
 0x62c   :  { %v1167_v7 = vpop.permute.xlu1 %1166 }
 0x630   :  { %v1247_v11 = vpop.permute.xlu1 %1246 }
 0x633   :  { %v5058_v1 = vpop.eup %5057 }
 0x634   :  { %v921_v2 = vsel %vm338_vm4, %v5058_v1, 0.0  ;;  %v1245_v12 = vpop.permute.xlu1 %1244 }
 0x635   :  { %922 = vadd.xlane.f32.xlu0 %v921_v2 }
 0x64b   :  { %1168 = vrot.lane.b32.xlu0 %v5543_v21, %s5313_s29 }
 0x668   :  { %v905_v3 = vpop.f32.mrb[8].mxu0 }
 0x669   :  { %v4720_v4 = vpop.f32.mrb[9].mxu0  ;;  %v912_v5 = vsel %vm338_vm4, %v905_v3, -inf }
 0x66a   :  { %913 = vmax.xlane.f32.xlu1 %v912_v5 }
 0x6c2   :  { %v923_v6 = vpop.xlane.xlu0 %922 }
 0x6c3   :  { %5059 = vrcp.f32 %v923_v6 }
 0x6c6   :  { %v1169_v10 = vpop.permute.xlu0 %1168 }
 0x6cd   :  { %v5060_v8 = vpop.eup %5059 }
 0x6ce   :  { %v928_v9 = vmul.f32 %v5060_v8, %v5058_v1 }
 0x6d0   :  { %4724 = vmatmul.mubr.msk.f32.vlgmr.msra.gmra.mrb[8].mxu1 %vm338_vm4, %v928_v9 }
 0x6d1   :  { %4737 = vmatpush3.xpose.msk.msra.mxu1 %vm338_vm4, %v1169_v10  ;;  %4738 = vmatprep.mubr.msk.f32.mxu1 %vm5306_vm3, %v5305_v17 }
 0x6d2   :  { %4741 = vmatprep.subr.mxu1 %v5305_v17 }
 0x6d4   :  { %4739 = vmatmul.mubr.msk.f32.vlgmr.msra.gmra.mrb[10].mxu1 %vm338_vm4, %v1167_v7 }
 0x6d5   :  { %4742 = vmatpush3.xpose.msk.msra.mxu1 %vm338_vm4, %v1247_v11  ;;  %4743 = vmatprep.mubr.msk.f32.mxu1 %vm5306_vm3, %v5305_v17 }
 0x6d6   :  { %4751 = vmatprep.subr.mxu1 %v5305_v17 }
 0x6d8   :  { %4744 = vmatmul.mubr.msk.f32.vlgmr.msra.gmra.mrb[12].mxu1 %vm338_vm4, %v1245_v12 }
 0x6d9   :  { %4753 = vmatprep.mubr.msk.f32.mxu1 %vm5306_vm3, %v5305_v17 }
 0x6f7   :  { %v914_v13 = vpop.xlane.xlu1 %913 }
 0x6f8   :  { %v916_v14 = vsub.f32 %v905_v3, %v914_v13 }
 0x6fa   :  { %v919_v18 = vmul.f32 1.442695, %v916_v14 }
 0x6fc   :  { %5061 = vpow2.f32 %v919_v18 }
 0x706   :  { %v5062_v19 = vpop.eup %5061 }
 0x707   :  { %v924_v20 = vsel %vm338_vm4, %v5062_v19, 0.0 }
 0x708   :  { %925 = vadd.xlane.f32.xlu0 %v924_v20 }
 0x71e   :  { %1007 = vrot.lane.b32.xlu0 %v5547_v22, %s5311_s30 }
 0x722   :  { %1420 = vrot.lane.b32.xlu0 %v5547_v22, %s5314_s18 }
 0x726   :  { %1581 = vrot.lane.b32.xlu0 %v5543_v21, %s5315_s1 }
 0x72a   :  { %1659 = vrot.lane.b32.xlu0 %v5547_v22, %s5315_s1 }
 0x72e   :  { %1579 = vrot.lane.b32.xlu0 %v5543_v21, %s5316_s26 }
 0x795   :  { %v926_v23 = vpop.xlane.xlu0 %925 }
 0x796   :  { %5063 = vrcp.f32 %v926_v23 }
 0x799   :  { %v1008_v24 = vpop.permute.xlu0 %1007 }
 0x79a   :  { %4727 = vmatpush3.msra.mxu0 %v1008_v24 }
 0x79b   :  { %4731 = vmatprep.subr.mxu0 %v332_v36 }
 0x79d   :  { %v1421_v25 = vpop.permute.xlu0 %1420 }
 0x79e   :  { %4752 = vmatpush3.msra.mxu1 %v1421_v25 }
 0x79f   :  { %4761 = vmatprep.subr.mxu1 %v5305_v17 }
 0x7a0   :  { %v5064_v26 = vpop.eup %5063 }
 0x7a1   :  { %v930_v27 = vmul.f32 %v5064_v26, %v5062_v19  ;;  %v1582_v53 = vpop.permute.xlu0 %1581  ;;  %v334_v26 = vld [vmem:[#allocation8 + $0x18] sm:$0xff] }
 0x7a3   :  { %v1003_v28 = vpop.f32.mrb[8].mxu1  ;;  %4729 = vmatmul.mubr.msk.f32.vlgmr.msra.gmra.mrb[10].mxu0 %vm338_vm4, %v930_v27 }
 0x7a4   :  { %v4725_v29 = vpop.f32.mrb[9].mxu1  ;;  %4733 = vmatprep.mubr.msk.f32.mxu0 %vm338_vm4, %v1003_v28  ;;  %4732 = vmatpush3.msra.mxu0 %v332_v36 }
 0x7a5   :  { %4746 = vmatprep.subr.mxu0 %v5305_v17  ;;  %v1660_v57 = vpop.permute.xlu0 %1659 }
 0x7a7   :  { %v1240_v30 = vpop.f32.mrb[10].mxu1 }
 0x7a8   :  { %v4740_v31 = vpop.f32.mrb[11].mxu1  ;;  %v1322_v32 = vsel %vm338_vm4, %v1240_v30, -inf }
 0x7a9   :  { %1323 = vmax.xlane.f32.xlu1 %v1322_v32  ;;  %v1580_v59 = vpop.permute.xlu0 %1579 }
 0x7ab   :  { %v1318_v33 = vpop.f32.mrb[12].mxu1 }
 0x7ac   :  { %v4745_v34 = vpop.f32.mrb[13].mxu1  ;;  %v1325_v35 = vsel %vm338_vm4, %v1318_v33, -inf }
 0x7ad   :  { %1326 = vmax.xlane.f32.xlu1 %v1325_v35 }
 0x836   :  { %v1324_v37 = vpop.xlane.xlu1 %1323 }
 0x837   :  { %v1328_v38 = vsub.f32 %v1240_v30, %v1324_v37 }
 0x839   :  { %v1330_v39 = vmul.f32 1.442695, %v1328_v38 }
 0x83a   :  { %v1327_v40 = vpop.xlane.xlu1 %1326 }
 0x83b   :  { %5065 = vpow2.f32 %v1330_v39  ;;  %v1329_v41 = vsub.f32 %v1318_v33, %v1327_v40 }
 0x83d   :  { %v1332_v42 = vmul.f32 1.442695, %v1329_v41 }
 0x83f   :  { %5067 = vpow2.f32 %v1332_v42 }
 0x845   :  { %v5066_v43 = vpop.eup %5065 }
 0x846   :  { %v1334_v44 = vsel %vm338_vm4, %v5066_v43, 0.0 }
 0x847   :  { %1335 = vadd.xlane.f32.xlu1 %v1334_v44 }
 0x849   :  { %v5068_v45 = vpop.eup %5067 }
 0x84a   :  { %v1337_v46 = vsel %vm338_vm4, %v5068_v45, 0.0 }
 0x84b   :  { %1338 = vadd.xlane.f32.xlu1 %v1337_v46 }
 0x85c   :  { %1344 = vrot.lane.b32.xlu1 %v5543_v21, %s5314_s18 }
 0x860   :  { %1657 = vrot.lane.b32.xlu1 %v5547_v22, %s5316_s26 }
 0x876   :  { %v1079_v47 = vpop.f32.mrb[10].mxu0 }
 0x877   :  { %v4730_v48 = vpop.f32.mrb[11].mxu0  ;;  %4734 = vmatmul.mubr.msk.f32.vlgmr.msra.gmra.mrb[6].mxu0 %vm338_vm4, %v1079_v47 }
 0x878   :  { %4748 = vmatprep.mubr.msk.f32.mxu0 %vm5306_vm3, %v5305_v17 }
 0x8d4   :  { %v1336_v49 = vpop.xlane.xlu1 %1335 }
 0x8d5   :  { %5069 = vrcp.f32 %v1336_v49 }
 0x8d8   :  { %v1339_v50 = vpop.xlane.xlu1 %1338 }
 0x8d9   :  { %5071 = vrcp.f32 %v1339_v50 }
 0x8dc   :  { %v1345_v52 = vpop.permute.xlu1 %1344 }
 0x8dd   :  { %4747 = vmatpush3.msra.mxu0 %v1345_v52 }
 0x8de   :  { %4756 = vmatprep.subr.mxu0 %v333_v51 }
 0x8df   :  { %v5070_v54 = vpop.eup %5069 }
 0x8e0   :  { %v1341_v55 = vmul.f32 %v5070_v54, %v5066_v43  ;;  %v1658_v0 = vpop.permute.xlu1 %1657  ;;  %v2042_v54 = vld [vmem:[#allocation10 + $0x18] sm:$0xff] }
 0x8e2   :  { %4749 = vmatmul.mubr.msk.f32.vlgmr.msra.gmra.mrb[12].mxu0 %vm338_vm4, %v1341_v55 }
 0x8e3   :  { %v5072_v56 = vpop.eup %5071  ;;  %4757 = vmatpush3.msra.mxu0 %v333_v51  ;;  %v2040_v51 = vld [vmem:[#allocation10 + $0x8] sm:$0xff] }
 0x8e4   :  { %v1343_v58 = vmul.f32 %v5072_v56, %v5068_v45  ;;  %4766 = vmatprep.subr.mxu0 %v5305_v17  ;;  %v2133_v56 = vld [vmem:[#allocation11] sm:$0xff] }
 0x8e6   :  { %4754 = vmatmul.mubr.msk.f32.vlgmr.msra.gmra.mrb[14].mxu1 %vm338_vm4, %v1343_v58 }
 0x8e7   :  { %4762 = vmatpush3.xpose.msk.msra.mxu1 %vm338_vm4, %v1582_v53  ;;  %4763 = vmatprep.mubr.msk.f32.mxu1 %vm5306_vm3, %v5305_v17  ;;  %v2041_v53 = vld [vmem:[#allocation10 + $0x10] sm:$0xff] }
 0x8e8   :  { %4771 = vmatprep.subr.mxu1 %v5305_v17  ;;  %v4968_v55 = vpack.c.bf16 %v2042_v54, %v2041_v53  ;;  %v4473_v54 = vld [vmem:[%s5953_s13] ss:$0 sm:$0xff] }
 0x8ea   :  { %4764 = vmatmul.mubr.msk.f32.vlgmr.msra.gmra.mrb[16].mxu1 %vm338_vm4, %v1580_v59 }
 0x8eb   :  { %4773 = vmatprep.mubr.msk.f32.mxu1 %vm5306_vm3, %v5305_v17 }
 0x9b5   :  { %v1416_v60 = vpop.f32.mrb[12].mxu0 }
 0x9b6   :  { %v4750_v61 = vpop.f32.mrb[13].mxu0  ;;  %4758 = vmatprep.mubr.msk.f32.mxu0 %vm338_vm4, %v1416_v60 }
 0x9b9   :  { %v1492_v62 = vpop.f32.mrb[14].mxu1 }
 0x9ba   :  { %v4755_v63 = vpop.f32.mrb[15].mxu1  ;;  %4759 = vmatmul.mubr.msk.f32.vlgmr.msra.gmra.mrb[6].mxu0 %vm338_vm4, %v1492_v62 }
 0x9bb   :  { %4767 = vmatpush3.xpose.msk.msra.mxu0 %vm338_vm4, %v1660_v57  ;;  %4768 = vmatprep.mubr.msk.f32.mxu0 %vm5306_vm3, %v5305_v17  ;;  %v2134_v57 = vld [vmem:[#allocation11 + $0x8] sm:$0xff] }
 0x9bc   :  { %4776 = vmatprep.subr.mxu0 %v5305_v17  ;;  %v4972_v58 = vpack.c.bf16 %v2134_v57, %v2133_v56 }
 0x9bd   :  { %v1653_v1 = vpop.f32.mrb[16].mxu1 }
 0x9be   :  { %v4765_v2 = vpop.f32.mrb[17].mxu1  ;;  %4769 = vmatmul.mubr.msk.f32.vlgmr.msra.gmra.mrb[14].mxu0 %vm338_vm4, %v1658_v0  ;;  %v1735_v3 = vsel %vm338_vm4, %v1653_v1, -inf }
 0x9bf   :  { %1736 = vmax.xlane.f32.xlu0 %v1735_v3  ;;  %4778 = vmatprep.mubr.msk.f32.mxu0 %vm5306_vm3, %v5305_v17  ;;  %v4465_v2 = vld [vmem:[%s5947_s7] ss:$0 sm:$0xff] }
 0xa4c   :  { %v1737_v4 = vpop.xlane.xlu0 %1736 }
 0xa4d   :  { %v1741_v5 = vsub.f32 %v1653_v1, %v1737_v4 }
 0xa4f   :  { %v1743_v6 = vmul.f32 1.442695, %v1741_v5 }
 0xa51   :  { %5073 = vpow2.f32 %v1743_v6  ;;  %v4466_v6 = vld [vmem:[%s5948_s8] ss:$0 sm:$0xff] }
 0xa5b   :  { %v5074_v7 = vpop.eup %5073 }
 0xa5c   :  { %v1747_v8 = vsel %vm338_vm4, %v5074_v7, 0.0 }
 0xa5d   :  { %1748 = vadd.xlane.f32.xlu0 %v1747_v8 }
 0xa91   :  { %v1731_v9 = vpop.f32.mrb[14].mxu0 }
 0xa92   :  { %v4770_v10 = vpop.f32.mrb[15].mxu0  ;;  %v1738_v11 = vsel %vm338_vm4, %v1731_v9, -inf }
 0xa93   :  { %1739 = vmax.xlane.f32.xlu1 %v1738_v11  ;;  %v2135_v11 = vld [vmem:[#allocation11 + $0x10] sm:$0xff] }
 0xaa4   :  { %1757 = vrot.lane.b32.xlu1 %v5543_v21, %s5317_s19 }
 0xaea   :  { %v1749_v12 = vpop.xlane.xlu0 %1748 }
 0xaeb   :  { %5075 = vrcp.f32 %v1749_v12  ;;  %v2136_v12 = vld [vmem:[#allocation11 + $0x18] sm:$0xff] }
 0xaf5   :  { %v5076_v14 = vpop.eup %5075 }
 0xaf6   :  { %v1754_v20 = vmul.f32 %v5076_v14, %v5074_v7  ;;  %v4467_v14 = vld [vmem:[%s5950_s10] ss:$0 sm:$0xff] }
 0xb20   :  { %v1740_v13 = vpop.xlane.xlu1 %1739 }
 0xb21   :  { %v1742_v18 = vsub.f32 %v1731_v9, %v1740_v13  ;;  %v4976_v13 = vpack.c.bf16 %v2136_v12, %v2135_v11 }
 0xb23   :  { %v1745_v19 = vmul.f32 1.442695, %v1742_v18 }
 0xb24   :  { %v1758_v23 = vpop.permute.xlu1 %1757 }
 0xb25   :  { %5077 = vpow2.f32 %v1745_v19  ;;  %4772 = vmatpush3.msra.mxu1 %v1758_v23 }
 0xb26   :  { %4774 = vmatmul.mubr.msk.f32.vlgmr.msra.gmra.mrb[18].mxu1 %vm338_vm4, %v1754_v20 }
 0xb2f   :  { %v5078_v24 = vpop.eup %5077 }
 0xb30   :  { %v1750_v25 = vsel %vm338_vm4, %v5078_v24, 0.0 }
 0xb31   :  { %1751 = vadd.xlane.f32.xlu0 %v1750_v25 }
 0xb47   :  { %1833 = vrot.lane.b32.xlu0 %v5547_v22, %s5317_s19  ;;  %v4440_v22 = vld [vmem:[%s5946_s6] ss:$0 sm:$0xff] }
 0xbbe   :  { %v1752_v21 = vpop.xlane.xlu0 %1751 }
 0xbbf   :  { %5079 = vrcp.f32 %v1752_v21  ;;  %v4470_v21 = vld [vmem:[%s5952_s12] ss:$0 sm:$0xff] }
 0xbc2   :  { %v1834_v27 = vpop.permute.xlu0 %1833 }
 0xbc3   :  { %4777 = vmatpush3.msra.mxu0 %v1834_v27 }
 0xbc4   :  { %4781 = vmatprep.subr.mxu0 %v334_v26 }
 0xbc9   :  { %v5080_v28 = vpop.eup %5079 }
 0xbca   :  { %v1756_v29 = vmul.f32 %v5080_v28, %v5078_v24 }
 0xbcc   :  { %4779 = vmatmul.mubr.msk.f32.vlgmr.msra.gmra.mrb[16].mxu0 %vm338_vm4, %v1756_v29 }
 0xbcd   :  { %4782 = vmatpush3.msra.mxu0 %v334_v26 }
 0xbce   :  { %4973 = vmatprep.subr.bf16.mxu0 %v4972_v58 }
 0xbf9   :  { %v1829_v30 = vpop.f32.mrb[18].mxu1 }
 0xbfa   :  { %v4775_v31 = vpop.f32.mrb[19].mxu1  ;;  %4783 = vmatprep.mubr.msk.f32.mxu0 %vm338_vm4, %v1829_v30 }
 0xc9f   :  { %v1905_v32 = vpop.f32.mrb[16].mxu0 }
 0xca0   :  { %v4780_v33 = vpop.f32.mrb[17].mxu0  ;;  %4784 = vmatmul.mubr.msk.f32.vlgmr.msra.gmra.mrb[6].mxu0 %vm338_vm4, %v1905_v32 }
 0xca1   :  { %4975 = vmatpush3.bf16.msra.mxu0 %v4972_v58  ;;  %v4474_v58 = vld [vmem:[%s5954_s14] ss:$0 sm:$0xff] }
 0xca2   :  { %4977 = vmatprep.subr.bf16.mxu0 %v4976_v13 }
 0xca5   :  { %4979 = vmatpush3.bf16.msra.mxu0 %v4976_v13 }
 0xca6   :  { %4819 = vmatprep.subr.mxu0 %v5305_v17 }
 0xd73   :  { %v4785_v34 = vpop.f32.mrb[6].mxu0 }
 0xd74   :  { %v5010_v35 = vadd.f32 %v4785_v34, %v4440_v22  ;;  %v1981_v36 = vpop.f32.mrb[7].mxu0 }
 0xd75   :  { %v5011_v37 = vadd.f32 %v4440_v22, %v1981_v36 }
 0xd76   :  { %v1993_v38 = vadd.f32 %v5010_v35, %v5528_v16 }
 0xd77   :  { %v1992_v39 = vadd.f32 %v5011_v37, %v5526_v15  ;;  %v2039_v15 = vld [vmem:[#allocation10] sm:$0xff] }
 0xd78   :  { %v1999_v40 = vsel %vm248_vm2, %v1993_v38, 0.0  ;;  %v4964_v52 = vpack.c.bf16 %v2040_v51, %v2039_v15 }
 0xd79   :  { %2000 = vadd.xlane.f32.xlu0 %v1999_v40  ;;  %v1996_v41 = vsel %vm248_vm2, %v1992_v39, 0.0 }
 0xd7a   :  { %1997 = vadd.xlane.f32.xlu1 %v1996_v41  ;;  %4965 = vmatprep.subr.bf16.mxu1 %v4964_v52 }
 0xd7b   :  { %4967 = vmatpush3.bf16.msra.mxu1 %v4964_v52 }
 0xd7c   :  { %4969 = vmatprep.subr.bf16.mxu1 %v4968_v55 }
 0xd7f   :  { %4971 = vmatpush3.bf16.msra.mxu1 %v4968_v55 }
 0xe06   :  { %v2001_v42 = vpop.xlane.xlu0 %2000 }
 0xe07   :  { %v2004_v43 = vmul.f32 0.03125, %v2001_v42  ;;  %v1998_v44 = vpop.xlane.xlu1 %1997 }
 0xe08   :  { %v2003_v45 = vmul.f32 0.03125, %v1998_v44  ;;  %v2273_v44 = vld [vmem:[#allocation7 + $0x28] sm:$0xff] }
 0xe09   :  { %v2006_v46 = vsub.f32 %v1993_v38, %v2004_v43  ;;  %v2272_v43 = vld [vmem:[#allocation7 + $0x20] sm:$0xff] }
 0xe0a   :  { %v2005_v47 = vsub.f32 %v1992_v39, %v2003_v45  ;;  %v4980_v45 = vpack.c.bf16 %v2273_v44, %v2272_v43 }
 0xe0b   :  { %v2008_v48 = vmul.f32 %v2006_v46, %v2006_v46 }
 0xe0c   :  { %v2007_v49 = vmul.f32 %v2005_v47, %v2005_v47  ;;  %4981 = vmatprep.subr.bf16.mxu1 %v4980_v45 }
 0xe0d   :  { %v2012_v50 = vsel %vm248_vm2, %v2008_v48, 0.0 }
 0xe0e   :  { %2013 = vadd.xlane.f32.xlu0 %v2012_v50  ;;  %v2009_v16 = vsel %vm248_vm2, %v2007_v49, 0.0 }
 0xe0f   :  { %2010 = vadd.xlane.f32.xlu1 %v2009_v16 }
 0xe9b   :  { %v2014_v59 = vpop.xlane.xlu0 %2013 }
 0xe9c   :  { %v2016_v60 = vmul.f32 0.03125, %v2014_v59  ;;  %v2011_v61 = vpop.xlane.xlu1 %2010 }
 0xe9d   :  { %v2015_v62 = vmul.f32 0.03125, %v2011_v61 }
 0xe9e   :  { %v2018_v63 = vadd.f32 1e-05, %v2016_v60 }
 0xe9f   :  { %v2017_v0 = vadd.f32 1e-05, %v2015_v62 }
 0xea0   :  { %5081 = vrsqrt.f32 %v2018_v63  ;;  %v4476_v63 = vld [vmem:[%s5944_s4 + $0x1] ss:$0 sm:$0xff] }
 0xea1   :  { %5083 = vrsqrt.f32 %v2017_v0 }
 0xeaa   :  { %v5082_v1 = vpop.eup %5081 }
 0xeab   :  { %v5084_v3 = vpop.eup %5083  ;;  %v2022_v4 = vmul.f32 %v5082_v1, %v2006_v46  ;;  %v2274_v46 = vld [vmem:[#allocation7 + $0x30] sm:$0xff] }
 0xeac   :  { %v2021_v5 = vmul.f32 %v5084_v3, %v2005_v47  ;;  %v2275_v47 = vld [vmem:[#allocation7 + $0x38] sm:$0xff] }
 0xead   :  { %v2030_v7 = vmul.f32 %v4465_v2, %v2022_v4  ;;  %v4984_v48 = vpack.c.bf16 %v2275_v47, %v2274_v46 }
 0xeae   :  { %v2029_v8 = vmul.f32 %v4465_v2, %v2021_v5 }
 0xeaf   :  { %v2038_v10 = vadd.f32 %v4466_v6, %v2030_v7 }
 0xeb0   :  { %v2037_v9 = vadd.f32 %v4466_v6, %v2029_v8 }
 0xeb2   :  { %4794 = vmatprep.mubr.msk.f32.mxu1 %vm248_vm2, %v2037_v9 }
 0xeb3   :  { %4795 = vmatmul.mubr.msk.f32.vlgmr.msra.gmra.mrb[20].mxu1 %vm248_vm2, %v2038_v10 }
 0xeb4   :  { %4983 = vmatpush3.bf16.msra.mxu1 %v4980_v45 }
 0xeb5   :  { %4985 = vmatprep.subr.bf16.mxu1 %v4984_v48 }
 0xeb8   :  { %4987 = vmatpush3.bf16.msra.mxu1 %v4984_v48 }
 0xeb9   :  { %4824 = vmatprep.subr.mxu1 %v5305_v17 }
 0xf86   :  { %v4796_v18 = vpop.f32.mrb[20].mxu1 }
 0xf87   :  { %v2128_v19 = vadd.f32 %v4796_v18, %v4467_v14  ;;  %v2122_v20 = vpop.f32.mrb[21].mxu1 }
 0xf88   :  { %v2123_v23 = vadd.f32 %v4467_v14, %v2122_v20 }
 0xf89   :  { %v2132_v25 = vmax.f32 %v2128_v19, 0.0 }
 0xf8a   :  { %v2131_v24 = vmax.f32 %v2123_v23, 0.0 }
 0xf8c   :  { %4805 = vmatprep.mubr.msk.f32.mxu0 %vm248_vm2, %v2131_v24 }
 0xf8d   :  { %4806 = vmatmul.mubr.msk.f32.vlgmr.msra.gmra.mrb[18].mxu0 %vm248_vm2, %v2132_v25 }
 0xf8e   :  { %4821 = vmatprep.mubr.msk.f32.mxu0 %vm5306_vm3, %v5305_v17 }
0x1060   :  { %v4807_v26 = vpop.f32.mrb[18].mxu0 }
0x1061   :  { %v2222_v27 = vadd.f32 %v4807_v26, %v4470_v21  ;;  %v2216_v28 = vpop.f32.mrb[19].mxu0 }
0x1062   :  { %v2217_v29 = vadd.f32 %v4470_v21, %v2216_v28 }
0x1063   :  { %v2226_v30 = vadd.f32 %v2222_v27, %v2038_v10 }
0x1064   :  { %v2225_v31 = vadd.f32 %v2217_v29, %v2037_v9  ;;  %v2368_v29 = vld [vmem:[#allocation8 + $0x20] sm:$0xff] }
0x1065   :  { %v2232_v32 = vsel %vm248_vm2, %v2226_v30, 0.0 }
0x1066   :  { %2233 = vadd.xlane.f32.xlu0 %v2232_v32  ;;  %v2229_v33 = vsel %vm248_vm2, %v2225_v31, 0.0 }
0x1067   :  { %2230 = vadd.xlane.f32.xlu1 %v2229_v33 }
0x10f3   :  { %v2234_v22 = vpop.xlane.xlu0 %2233 }
0x10f4   :  { %v2236_v34 = vmul.f32 0.03125, %v2234_v22  ;;  %v2231_v35 = vpop.xlane.xlu1 %2230 }
0x10f5   :  { %v2235_v36 = vmul.f32 0.03125, %v2231_v35 }
0x10f6   :  { %v2238_v37 = vsub.f32 %v2226_v30, %v2236_v34 }
0x10f7   :  { %v2237_v38 = vsub.f32 %v2225_v31, %v2235_v36 }
0x10f8   :  { %v2240_v39 = vmul.f32 %v2238_v37, %v2238_v37 }
0x10f9   :  { %v2239_v40 = vmul.f32 %v2237_v38, %v2237_v38 }
0x10fa   :  { %v2244_v41 = vsel %vm248_vm2, %v2240_v39, 0.0 }
0x10fb   :  { %2245 = vadd.xlane.f32.xlu0 %v2244_v41  ;;  %v2241_v42 = vsel %vm248_vm2, %v2239_v40, 0.0 }
0x10fc   :  { %2242 = vadd.xlane.f32.xlu1 %v2241_v42 }
0x1188   :  { %v2246_v49 = vpop.xlane.xlu0 %2245 }
0x1189   :  { %v2248_v50 = vmul.f32 0.03125, %v2246_v49  ;;  %v2243_v16 = vpop.xlane.xlu1 %2242 }
0x118a   :  { %v2247_v15 = vmul.f32 0.03125, %v2243_v16 }
0x118b   :  { %v2250_v51 = vadd.f32 1e-05, %v2248_v50 }
0x118c   :  { %v2249_v52 = vadd.f32 1e-05, %v2247_v15 }
0x118d   :  { %5085 = vrsqrt.f32 %v2250_v51 }
0x118e   :  { %5087 = vrsqrt.f32 %v2249_v52 }
0x1197   :  { %v5086_v53 = vpop.eup %5085 }
0x1198   :  { %v5088_v55 = vpop.eup %5087  ;;  %v2254_v56 = vmul.f32 %v5086_v53, %v2238_v37 }
0x1199   :  { %v2253_v57 = vmul.f32 %v5088_v55, %v2237_v38 }
0x119a   :  { %v2262_v59 = vmul.f32 %v4473_v54, %v2254_v56 }
0x119b   :  { %v2261_v60 = vmul.f32 %v4473_v54, %v2253_v57 }
0x119c   :  { %v5724_v62 = vadd.f32 %v4474_v58, %v2262_v59 }
0x119d   :  { %v5722_v61 = vadd.f32 %v4474_v58, %v2261_v60 }
0x119f   :  { %4816 = vmatprep.mubr.msk.f32.mxu1 %vm248_vm2, %v5722_v61 }
0x11a0   :  { %4817 = vmatmul.mubr.msk.f32.vlgmr.msra.gmra.mrb[22].mxu1 %vm248_vm2, %v5724_v62 }
0x11a1   :  { %4826 = vmatprep.mubr.msk.f32.mxu1 %vm5306_vm3, %v5305_v17 }
0x1273   :  { %v4818_v0 = vpop.f32.mrb[22].mxu1 }
0x1274   :  { %v5735_v1 = vadd.f32 %v4818_v0, %v4476_v63  ;;  %v2356_v2 = vpop.f32.mrb[23].mxu1 }
0x1275   :  { %v5737_v3 = vadd.f32 %v4476_v63, %v2356_v2 }
0x1276   :  { %2450 = vrot.lane.b32.xlu0 %v5735_v1, %s5307_s27 }
0x1277   :  { %2373 = vrot.lane.b32.xlu1 %v5737_v3, %s5307_s27 }
0x12e8   :  { %v2451_v4 = vpop.permute.xlu0 %2450 }
0x12e9   :  { %4825 = vmatpush3.xpose.msk.msra.mxu1 %vm338_vm4, %v2451_v4  ;;  %v2374_v5 = vpop.permute.xlu1 %2373 }
0x12ea   :  { %4820 = vmatpush3.xpose.msk.msra.mxu0 %vm338_vm4, %v2374_v5  ;;  %4834 = vmatprep.subr.mxu1 %v5305_v17 }
0x12eb   :  { %4829 = vmatprep.subr.mxu0 %v5305_v17 }
0x12ec   :  { %4827 = vmatmul.mubr.msk.f32.vlgmr.msra.gmra.mrb[24].mxu1 %vm338_vm4, %v5735_v1 }
0x12ed   :  { %4822 = vmatmul.mubr.msk.f32.vlgmr.msra.gmra.mrb[20].mxu0 %vm338_vm4, %v5737_v3  ;;  %4836 = vmatprep.mubr.msk.f32.mxu1 %vm5306_vm3, %v5305_v17 }
0x12ee   :  { %4831 = vmatprep.mubr.msk.f32.mxu0 %vm5306_vm3, %v5305_v17 }
0x13bf   :  { %v2522_v6 = vpop.f32.mrb[24].mxu1 }
0x13c0   :  { %v2445_v7 = vpop.f32.mrb[20].mxu0  ;;  %v4828_v8 = vpop.f32.mrb[25].mxu1  ;;  %v2529_v9 = vsel %vm338_vm4, %v2522_v6, -inf }
0x13c1   :  { %2530 = vmax.xlane.f32.xlu0 %v2529_v9  ;;  %v4823_v10 = vpop.f32.mrb[21].mxu0  ;;  %v2526_v11 = vsel %vm338_vm4, %v2445_v7, -inf }
0x13c2   :  { %2527 = vmax.xlane.f32.xlu1 %v2526_v11 }
0x144e   :  { %v2531_v12 = vpop.xlane.xlu0 %2530 }
0x144f   :  { %v2533_v13 = vsub.f32 %v2522_v6, %v2531_v12  ;;  %v2528_v14 = vpop.xlane.xlu1 %2527 }
0x1450   :  { %v2532_v18 = vsub.f32 %v2445_v7, %v2528_v14 }
0x1451   :  { %v2536_v19 = vmul.f32 1.442695, %v2533_v13 }
0x1452   :  { %v2534_v20 = vmul.f32 1.442695, %v2532_v18 }
0x1453   :  { %5089 = vpow2.f32 %v2536_v19 }
0x1454   :  { %5091 = vpow2.f32 %v2534_v20  ;;  %v2369_v20 = vld [vmem:[#allocation8 + $0x28] sm:$0xff] }
0x145d   :  { %v5090_v23 = vpop.eup %5089 }
0x145e   :  { %v5092_v24 = vpop.eup %5091  ;;  %v2541_v25 = vsel %vm338_vm4, %v5090_v23, 0.0 }
0x145f   :  { %2542 = vadd.xlane.f32.xlu0 %v2541_v25  ;;  %v2538_v21 = vsel %vm338_vm4, %v5092_v24, 0.0 }
0x1460   :  { %2539 = vadd.xlane.f32.xlu1 %v2538_v21 }
0x1471   :  { %2548 = vrot.lane.b32.xlu1 %v5737_v3, %s5308_s16 }
0x1475   :  { %2624 = vrot.lane.b32.xlu0 %v5735_v1, %s5308_s16  ;;  %2791 = vrot.lane.b32.xlu1 %v5737_v3, %s5309_s17 }
0x1479   :  { %2869 = vrot.lane.b32.xlu0 %v5735_v1, %s5309_s17  ;;  %2789 = vrot.lane.b32.xlu1 %v5737_v3, %s5310_s28 }
0x147d   :  { %2867 = vrot.lane.b32.xlu1 %v5735_v1, %s5310_s28 }
0x1481   :  { %3204 = vrot.lane.b32.xlu1 %v5737_v3, %s5313_s29 }
0x14ec   :  { %v2543_v26 = vpop.xlane.xlu0 %2542 }
0x14ed   :  { %5093 = vrcp.f32 %v2543_v26  ;;  %v2540_v27 = vpop.xlane.xlu1 %2539 }
0x14ee   :  { %5095 = vrcp.f32 %v2540_v27 }
0x14f0   :  { %v2625_v28 = vpop.permute.xlu0 %2624 }
0x14f1   :  { %4835 = vmatpush3.msra.mxu1 %v2625_v28  ;;  %v2549_v30 = vpop.permute.xlu1 %2548 }
0x14f2   :  { %4830 = vmatpush3.msra.mxu0 %v2549_v30  ;;  %4844 = vmatprep.subr.mxu1 %v5305_v17 }
0x14f3   :  { %4839 = vmatprep.subr.mxu0 %v2368_v29 }
0x14f4   :  { %v2870_v40 = vpop.permute.xlu0 %2869 }
0x14f5   :  { %v2792_v32 = vpop.permute.xlu1 %2791 }
0x14f7   :  { %v5094_v31 = vpop.eup %5093 }
0x14f8   :  { %v5096_v33 = vpop.eup %5095  ;;  %v2547_v22 = vmul.f32 %v5094_v31, %v5090_v23 }
0x14f9   :  { %v2545_v34 = vmul.f32 %v5096_v33, %v5092_v24  ;;  %v2790_v35 = vpop.permute.xlu1 %2789 }
0x14fa   :  { %4837 = vmatmul.mubr.msk.f32.vlgmr.msra.gmra.mrb[26].mxu1 %vm338_vm4, %v2547_v22 }
0x14fb   :  { %4845 = vmatpush3.xpose.msk.msra.mxu1 %vm338_vm4, %v2792_v32  ;;  %4832 = vmatmul.mubr.msk.f32.vlgmr.msra.gmra.mrb[22].mxu0 %vm338_vm4, %v2545_v34 }
0x14fc   :  { %4846 = vmatprep.mubr.msk.f32.mxu1 %vm5306_vm3, %v5305_v17  ;;  %4840 = vmatpush3.msra.mxu0 %v2368_v29 }
0x14fd   :  { %4849 = vmatprep.subr.mxu0 %v5305_v17  ;;  %4854 = vmatprep.subr.mxu1 %v5305_v17  ;;  %v2868_v44 = vpop.permute.xlu1 %2867 }
0x14fe   :  { %4847 = vmatmul.mubr.msk.f32.vlgmr.msra.gmra.mrb[28].mxu1 %vm338_vm4, %v2790_v35  ;;  %v2370_v35 = vld [vmem:[#allocation8 + $0x30] sm:$0xff] }
0x14ff   :  { %4856 = vmatprep.mubr.msk.f32.mxu1 %vm5306_vm3, %v5305_v17 }
0x1501   :  { %v3205_v52 = vpop.permute.xlu1 %3204 }
0x15cd   :  { %v2696_v36 = vpop.f32.mrb[26].mxu1 }
0x15ce   :  { %v2620_v37 = vpop.f32.mrb[22].mxu0  ;;  %v4838_v38 = vpop.f32.mrb[27].mxu1 }
0x15cf   :  { %v4833_v39 = vpop.f32.mrb[23].mxu0  ;;  %4841 = vmatprep.mubr.msk.f32.mxu0 %vm338_vm4, %v2620_v37 }
0x15d0   :  { %4842 = vmatmul.mubr.msk.f32.vlgmr.msra.gmra.mrb[24].mxu0 %vm338_vm4, %v2696_v36 }
0x15d1   :  { %4850 = vmatpush3.xpose.msk.msra.mxu0 %vm338_vm4, %v2870_v40  ;;  %v2863_v41 = vpop.f32.mrb[28].mxu1  ;;  %4851 = vmatprep.mubr.msk.f32.mxu0 %vm5306_vm3, %v5305_v17 }
0x15d2   :  { %v4848_v42 = vpop.f32.mrb[29].mxu1  ;;  %v2945_v43 = vsel %vm338_vm4, %v2863_v41, -inf  ;;  %4859 = vmatprep.subr.mxu0 %v5305_v17 }
0x15d3   :  { %2946 = vmax.xlane.f32.xlu0 %v2945_v43 }
0x15d4   :  { %4852 = vmatmul.mubr.msk.f32.vlgmr.msra.gmra.mrb[26].mxu0 %vm338_vm4, %v2868_v44 }
0x15d5   :  { %4861 = vmatprep.mubr.msk.f32.mxu0 %vm5306_vm3, %v5305_v17 }
0x15e9   :  { %2967 = vrot.lane.b32.xlu0 %v5737_v3, %s5311_s30 }
0x15ed   :  { %3202 = vrot.lane.b32.xlu0 %v5737_v3, %s5312_s3 }
0x15f1   :  { %3280 = vrot.lane.b32.xlu0 %v5735_v1, %s5312_s3 }
0x1660   :  { %v2947_v45 = vpop.xlane.xlu0 %2946 }
0x1661   :  { %v2951_v46 = vsub.f32 %v2863_v41, %v2947_v45 }
0x1663   :  { %v2953_v47 = vmul.f32 1.442695, %v2951_v46 }
0x1664   :  { %v2968_v48 = vpop.permute.xlu0 %2967 }
0x1665   :  { %5097 = vpow2.f32 %v2953_v47  ;;  %4855 = vmatpush3.msra.mxu1 %v2968_v48 }
0x1666   :  { %4869 = vmatprep.subr.mxu1 %v5305_v17 }
0x1668   :  { %v3203_v56 = vpop.permute.xlu0 %3202 }
0x166c   :  { %v3281_v58 = vpop.permute.xlu0 %3280 }
0x166f   :  { %v5098_v49 = vpop.eup %5097 }
0x1670   :  { %v2957_v50 = vsel %vm338_vm4, %v5098_v49, 0.0 }
0x1671   :  { %2958 = vadd.xlane.f32.xlu1 %v2957_v50 }
0x1682   :  { %3282 = vrot.lane.b32.xlu1 %v5735_v1, %s5313_s29 }
0x16a7   :  { %v2941_v16 = vpop.f32.mrb[26].mxu0 }
0x16a8   :  { %v4853_v15 = vpop.f32.mrb[27].mxu0  ;;  %v2948_v51 = vsel %vm338_vm4, %v2941_v16, -inf }
0x16a9   :  { %2949 = vmax.xlane.f32.xlu1 %v2948_v51 }
0x16fe   :  { %v2959_v53 = vpop.xlane.xlu1 %2958 }
0x16ff   :  { %5099 = vrcp.f32 %v2959_v53 }
0x1702   :  { %v3283_v57 = vpop.permute.xlu1 %3282 }
0x1709   :  { %v5100_v54 = vpop.eup %5099 }
0x170a   :  { %v2964_v55 = vmul.f32 %v5100_v54, %v5098_v49 }
0x170c   :  { %4857 = vmatmul.mubr.msk.f32.vlgmr.msra.gmra.mrb[30].mxu1 %vm338_vm4, %v2964_v55 }
0x170d   :  { %4870 = vmatpush3.xpose.msk.msra.mxu1 %vm338_vm4, %v3205_v52  ;;  %4871 = vmatprep.mubr.msk.f32.mxu1 %vm5306_vm3, %v5305_v17 }
0x170e   :  { %4874 = vmatprep.subr.mxu1 %v5305_v17 }
0x1710   :  { %4872 = vmatmul.mubr.msk.f32.vlgmr.msra.gmra.mrb[32].mxu1 %vm338_vm4, %v3203_v56 }
0x1711   :  { %4875 = vmatpush3.xpose.msk.msra.mxu1 %vm338_vm4, %v3283_v57  ;;  %4876 = vmatprep.mubr.msk.f32.mxu1 %vm5306_vm3, %v5305_v17 }
0x1712   :  { %4884 = vmatprep.subr.mxu1 %v5305_v17 }
0x1714   :  { %4877 = vmatmul.mubr.msk.f32.vlgmr.msra.gmra.mrb[34].mxu1 %vm338_vm4, %v3281_v58 }
0x1715   :  { %4886 = vmatprep.mubr.msk.f32.mxu1 %vm5306_vm3, %v5305_v17 }
0x1736   :  { %v2950_v59 = vpop.xlane.xlu1 %2949 }
0x1737   :  { %v2952_v60 = vsub.f32 %v2941_v16, %v2950_v59 }
0x1739   :  { %v2955_v63 = vmul.f32 1.442695, %v2952_v60 }
0x173b   :  { %5101 = vpow2.f32 %v2955_v63 }
0x1745   :  { %v5102_v0 = vpop.eup %5101 }
0x1746   :  { %v2960_v2 = vsel %vm338_vm4, %v5102_v0, 0.0 }
0x1747   :  { %2961 = vadd.xlane.f32.xlu0 %v2960_v2 }
0x175d   :  { %3043 = vrot.lane.b32.xlu0 %v5735_v1, %s5311_s30 }
0x1761   :  { %3456 = vrot.lane.b32.xlu0 %v5735_v1, %s5314_s18 }
0x1765   :  { %3617 = vrot.lane.b32.xlu0 %v5737_v3, %s5315_s1 }
0x1769   :  { %3695 = vrot.lane.b32.xlu0 %v5735_v1, %s5315_s1 }
0x176d   :  { %3615 = vrot.lane.b32.xlu0 %v5737_v3, %s5316_s26 }
0x17d4   :  { %v2962_v4 = vpop.xlane.xlu0 %2961 }
0x17d5   :  { %5103 = vrcp.f32 %v2962_v4 }
0x17d8   :  { %v3044_v5 = vpop.permute.xlu0 %3043 }
0x17d9   :  { %4860 = vmatpush3.msra.mxu0 %v3044_v5 }
0x17da   :  { %4864 = vmatprep.subr.mxu0 %v2369_v20 }
0x17dc   :  { %v3457_v6 = vpop.permute.xlu0 %3456 }
0x17dd   :  { %4885 = vmatpush3.msra.mxu1 %v3457_v6 }
0x17de   :  { %4894 = vmatprep.subr.mxu1 %v5305_v17 }
0x17df   :  { %v5104_v7 = vpop.eup %5103  ;;  %v3039_v8 = vpop.f32.mrb[30].mxu1 }
0x17e0   :  { %v2966_v9 = vmul.f32 %v5104_v7, %v5102_v0  ;;  %v4858_v10 = vpop.f32.mrb[31].mxu1  ;;  %v3618_v37 = vpop.permute.xlu0 %3617  ;;  %v2371_v7 = vld [vmem:[#allocation8 + $0x38] sm:$0xff] }
0x17e2   :  { %4862 = vmatmul.mubr.msk.f32.vlgmr.msra.gmra.mrb[28].mxu0 %vm338_vm4, %v2966_v9 }
0x17e3   :  { %4866 = vmatprep.mubr.msk.f32.mxu0 %vm338_vm4, %v3039_v8  ;;  %v3276_v11 = vpop.f32.mrb[32].mxu1  ;;  %4865 = vmatpush3.msra.mxu0 %v2369_v20 }
0x17e4   :  { %v4873_v12 = vpop.f32.mrb[33].mxu1  ;;  %v3358_v13 = vsel %vm338_vm4, %v3276_v11, -inf  ;;  %4879 = vmatprep.subr.mxu0 %v5305_v17  ;;  %v3696_v41 = vpop.permute.xlu0 %3695 }
0x17e5   :  { %3359 = vmax.xlane.f32.xlu1 %v3358_v13 }
0x17e7   :  { %v3354_v14 = vpop.f32.mrb[34].mxu1 }
0x17e8   :  { %v4878_v18 = vpop.f32.mrb[35].mxu1  ;;  %v3361_v19 = vsel %vm338_vm4, %v3354_v14, -inf  ;;  %v3616_v43 = vpop.permute.xlu0 %3615 }
0x17e9   :  { %3362 = vmax.xlane.f32.xlu1 %v3361_v19 }
0x1872   :  { %v3360_v23 = vpop.xlane.xlu1 %3359 }
0x1873   :  { %v3364_v24 = vsub.f32 %v3276_v11, %v3360_v23 }
0x1875   :  { %v3366_v25 = vmul.f32 1.442695, %v3364_v24 }
0x1876   :  { %v3363_v21 = vpop.xlane.xlu1 %3362 }
0x1877   :  { %5105 = vpow2.f32 %v3366_v25  ;;  %v3365_v26 = vsub.f32 %v3354_v14, %v3363_v21 }
0x1879   :  { %v3368_v27 = vmul.f32 1.442695, %v3365_v26 }
0x187b   :  { %5107 = vpow2.f32 %v3368_v27 }
0x1881   :  { %v5106_v28 = vpop.eup %5105 }
0x1882   :  { %v3370_v29 = vsel %vm338_vm4, %v5106_v28, 0.0 }
0x1883   :  { %3371 = vadd.xlane.f32.xlu1 %v3370_v29 }
0x1885   :  { %v5108_v30 = vpop.eup %5107 }
0x1886   :  { %v3373_v31 = vsel %vm338_vm4, %v5108_v30, 0.0 }
0x1887   :  { %3374 = vadd.xlane.f32.xlu1 %v3373_v31 }
0x1898   :  { %3380 = vrot.lane.b32.xlu1 %v5737_v3, %s5314_s18 }
0x189c   :  { %3693 = vrot.lane.b32.xlu1 %v5735_v1, %s5316_s26 }
0x18b5   :  { %v3115_v32 = vpop.f32.mrb[28].mxu0 }
0x18b6   :  { %v4863_v33 = vpop.f32.mrb[29].mxu0  ;;  %4867 = vmatmul.mubr.msk.f32.vlgmr.msra.gmra.mrb[24].mxu0 %vm338_vm4, %v3115_v32 }
0x18b7   :  { %4881 = vmatprep.mubr.msk.f32.mxu0 %vm5306_vm3, %v5305_v17 }
0x1910   :  { %v3372_v22 = vpop.xlane.xlu1 %3371 }
0x1911   :  { %5109 = vrcp.f32 %v3372_v22 }
0x1914   :  { %v3375_v34 = vpop.xlane.xlu1 %3374 }
0x1915   :  { %5111 = vrcp.f32 %v3375_v34 }
0x1918   :  { %v3381_v36 = vpop.permute.xlu1 %3380 }
0x1919   :  { %4880 = vmatpush3.msra.mxu0 %v3381_v36 }
0x191a   :  { %4889 = vmatprep.subr.mxu0 %v2370_v35 }
0x191b   :  { %v5110_v38 = vpop.eup %5109 }
0x191c   :  { %v3377_v39 = vmul.f32 %v5110_v38, %v5106_v28  ;;  %v3694_v48 = vpop.permute.xlu1 %3693  ;;  %v4080_v38 = vld [vmem:[#allocation10 + $0x38] sm:$0xff] }
0x191e   :  { %4882 = vmatmul.mubr.msk.f32.vlgmr.msra.gmra.mrb[30].mxu0 %vm338_vm4, %v3377_v39 }
0x191f   :  { %v5112_v40 = vpop.eup %5111  ;;  %4890 = vmatpush3.msra.mxu0 %v2370_v35  ;;  %v4078_v35 = vld [vmem:[#allocation10 + $0x28] sm:$0xff] }
0x1920   :  { %v3379_v42 = vmul.f32 %v5112_v40, %v5108_v30  ;;  %4899 = vmatprep.subr.mxu0 %v5305_v17  ;;  %v4173_v40 = vld [vmem:[#allocation11 + $0x20] sm:$0xff] }
0x1922   :  { %4887 = vmatmul.mubr.msk.f32.vlgmr.msra.gmra.mrb[36].mxu1 %vm338_vm4, %v3379_v42 }
0x1923   :  { %4895 = vmatpush3.xpose.msk.msra.mxu1 %vm338_vm4, %v3618_v37  ;;  %4896 = vmatprep.mubr.msk.f32.mxu1 %vm5306_vm3, %v5305_v17  ;;  %v4079_v37 = vld [vmem:[#allocation10 + $0x30] sm:$0xff] }
0x1924   :  { %4904 = vmatprep.subr.mxu1 %v5305_v17  ;;  %v4992_v39 = vpack.c.bf16 %v4080_v38, %v4079_v37  ;;  %v4527_v38 = vld [vmem:[%s5953_s13 + $0x1] ss:$0 sm:$0xff]  ;;  %s5319_s13 = smov [#allocation13]  }
0x1926   :  { %4897 = vmatmul.mubr.msk.f32.vlgmr.msra.gmra.mrb[38].mxu1 %vm338_vm4, %v3616_v43 }
0x1927   :  { %4906 = vmatprep.mubr.msk.f32.mxu1 %vm5306_vm3, %v5305_v17 }
0x19f1   :  { %v3452_v44 = vpop.f32.mrb[30].mxu0 }
0x19f2   :  { %v4883_v45 = vpop.f32.mrb[31].mxu0  ;;  %4891 = vmatprep.mubr.msk.f32.mxu0 %vm338_vm4, %v3452_v44 }
0x19f5   :  { %v3528_v46 = vpop.f32.mrb[36].mxu1 }
0x19f6   :  { %v4888_v47 = vpop.f32.mrb[37].mxu1  ;;  %4892 = vmatmul.mubr.msk.f32.vlgmr.msra.gmra.mrb[24].mxu0 %vm338_vm4, %v3528_v46 }
0x19f7   :  { %4900 = vmatpush3.xpose.msk.msra.mxu0 %vm338_vm4, %v3696_v41  ;;  %4901 = vmatprep.mubr.msk.f32.mxu0 %vm5306_vm3, %v5305_v17  ;;  %v4174_v41 = vld [vmem:[#allocation11 + $0x28] sm:$0xff] }
0x19f8   :  { %4909 = vmatprep.subr.mxu0 %v5305_v17  ;;  %v4996_v42 = vpack.c.bf16 %v4174_v41, %v4173_v40 }
0x19f9   :  { %v3689_v49 = vpop.f32.mrb[38].mxu1 }
0x19fa   :  { %v4898_v50 = vpop.f32.mrb[39].mxu1  ;;  %4902 = vmatmul.mubr.msk.f32.vlgmr.msra.gmra.mrb[32].mxu0 %vm338_vm4, %v3694_v48  ;;  %v3771_v16 = vsel %vm338_vm4, %v3689_v49, -inf }
0x19fb   :  { %3772 = vmax.xlane.f32.xlu0 %v3771_v16  ;;  %4911 = vmatprep.mubr.msk.f32.mxu0 %vm5306_vm3, %v5305_v17  ;;  %v4515_v50 = vld [vmem:[%s5947_s7 + $0x1] ss:$0 sm:$0xff] }
0x1a88   :  { %v3773_v15 = vpop.xlane.xlu0 %3772 }
0x1a89   :  { %v3777_v51 = vsub.f32 %v3689_v49, %v3773_v15 }
0x1a8b   :  { %v3779_v52 = vmul.f32 1.442695, %v3777_v51 }
0x1a8d   :  { %5113 = vpow2.f32 %v3779_v52  ;;  %v4516_v52 = vld [vmem:[%s5948_s8 + $0x1] ss:$0 sm:$0xff] }
0x1a97   :  { %v5114_v53 = vpop.eup %5113 }
0x1a98   :  { %v3783_v54 = vsel %vm338_vm4, %v5114_v53, 0.0 }
0x1a99   :  { %3784 = vadd.xlane.f32.xlu0 %v3783_v54 }
0x1acd   :  { %v3767_v55 = vpop.f32.mrb[32].mxu0 }
0x1ace   :  { %v4903_v56 = vpop.f32.mrb[33].mxu0  ;;  %v3774_v57 = vsel %vm338_vm4, %v3767_v55, -inf }
0x1acf   :  { %3775 = vmax.xlane.f32.xlu1 %v3774_v57  ;;  %v4175_v57 = vld [vmem:[#allocation11 + $0x30] sm:$0xff] }
0x1ae0   :  { %3793 = vrot.lane.b32.xlu1 %v5737_v3, %s5317_s19 }
0x1b26   :  { %v3785_v58 = vpop.xlane.xlu0 %3784 }
0x1b27   :  { %5115 = vrcp.f32 %v3785_v58  ;;  %v4176_v58 = vld [vmem:[#allocation11 + $0x38] sm:$0xff] }
0x1b31   :  { %v5116_v60 = vpop.eup %5115 }
0x1b32   :  { %v3790_v2 = vmul.f32 %v5116_v60, %v5114_v53  ;;  %v4518_v60 = vld [vmem:[%s5950_s10 + $0x1] ss:$0 sm:$0xff] }
0x1b5c   :  { %v3776_v59 = vpop.xlane.xlu1 %3775 }
0x1b5d   :  { %v3778_v63 = vsub.f32 %v3767_v55, %v3776_v59  ;;  %v5000_v59 = vpack.c.bf16 %v4176_v58, %v4175_v57 }
0x1b5f   :  { %v3781_v0 = vmul.f32 1.442695, %v3778_v63 }
0x1b60   :  { %v3794_v4 = vpop.permute.xlu1 %3793 }
0x1b61   :  { %5117 = vpow2.f32 %v3781_v0  ;;  %4905 = vmatpush3.msra.mxu1 %v3794_v4 }
0x1b62   :  { %4907 = vmatmul.mubr.msk.f32.vlgmr.msra.gmra.mrb[40].mxu1 %vm338_vm4, %v3790_v2 }
0x1b6b   :  { %v5118_v5 = vpop.eup %5117 }
0x1b6c   :  { %v3786_v6 = vsel %vm338_vm4, %v5118_v5, 0.0 }
0x1b6d   :  { %3787 = vadd.xlane.f32.xlu0 %v3786_v6 }
0x1b83   :  { %3869 = vrot.lane.b32.xlu0 %v5735_v1, %s5317_s19  ;;  %v4488_v1 = vld [vmem:[%s5946_s6 + $0x1] ss:$0 sm:$0xff] }
0x1bfa   :  { %v3788_v3 = vpop.xlane.xlu0 %3787 }
0x1bfb   :  { %5119 = vrcp.f32 %v3788_v3 }
0x1bfe   :  { %v3870_v8 = vpop.permute.xlu0 %3869 }
0x1bff   :  { %4910 = vmatpush3.msra.mxu0 %v3870_v8 }
0x1c00   :  { %4914 = vmatprep.subr.mxu0 %v2371_v7 }
0x1c05   :  { %v5120_v9 = vpop.eup %5119 }
0x1c06   :  { %v3792_v10 = vmul.f32 %v5120_v9, %v5118_v5 }
0x1c08   :  { %4912 = vmatmul.mubr.msk.f32.vlgmr.msra.gmra.mrb[34].mxu0 %vm338_vm4, %v3792_v10 }
0x1c09   :  { %4915 = vmatpush3.msra.mxu0 %v2371_v7 }
0x1c0a   :  { %4997 = vmatprep.subr.bf16.mxu0 %v4996_v42 }
0x1c35   :  { %v3865_v11 = vpop.f32.mrb[40].mxu1 }
0x1c36   :  { %v4908_v12 = vpop.f32.mrb[41].mxu1  ;;  %4916 = vmatprep.mubr.msk.f32.mxu0 %vm338_vm4, %v3865_v11 }
0x1cdb   :  { %v3941_v13 = vpop.f32.mrb[34].mxu0 }
0x1cdc   :  { %v4913_v14 = vpop.f32.mrb[35].mxu0  ;;  %4917 = vmatmul.mubr.msk.f32.vlgmr.msra.gmra.mrb[24].mxu0 %vm338_vm4, %v3941_v13 }
0x1cdd   :  { %4999 = vmatpush3.bf16.msra.mxu0 %v4996_v42  ;;  %v4528_v42 = vld [vmem:[%s5954_s14 + $0x1] ss:$0 sm:$0xff]  ;;  %s4413_s14 = sshll.u32 %s5319_s13, 4  ;;  %s4414_s14 = int_to_ptr.vmem [resolvable:$true] %s4413_s14 }
0x1cde   :  { %5001 = vmatprep.subr.bf16.mxu0 %v5000_v59  ;;  %s5265_s5 = scalar_lea.vmem %s4414_s14, 128  ;;  %p5270_p7 = scmp.lt.s32.totalorder %s4414_s14, %s4414_s14 }
0x1cdf   :  { %p5266_p6 = scmp.ne.s32.totalorder %s4414_s14, %s5265_s5  ;;  %p5271_p8 = scmp.lt.s32.totalorder %s5265_s5, %s5265_s5 }
0x1ce1   :  { %5003 = vmatpush3.bf16.msra.mxu0 %v5000_v59  ;;  %p5272_p9 = por %p5271_p8, %p5270_p7 }
0x1ce3   :  { %p5273_p10 = pnand %p5272_p9, %p5266_p6 }
0x1daf   :  { %v4918_v18 = vpop.f32.mrb[24].mxu0 }
0x1db0   :  { %v5012_v19 = vadd.f32 %v4918_v18, %v4488_v1  ;;  %v4017_v20 = vpop.f32.mrb[25].mxu0 }
0x1db1   :  { %v5013_v23 = vadd.f32 %v4488_v1, %v4017_v20 }
0x1db2   :  { %v4029_v24 = vadd.f32 %v5012_v19, %v5724_v62 }
0x1db3   :  { %v4028_v25 = vadd.f32 %v5013_v23, %v5722_v61  ;;  %v4077_v61 = vld [vmem:[#allocation10 + $0x20] sm:$0xff] }
0x1db4   :  { %v4037_v21 = vsel %vm248_vm2, %v4029_v24, 0.0  ;;  %v4988_v36 = vpack.c.bf16 %v4078_v35, %v4077_v61 }
0x1db5   :  { %4038 = vadd.xlane.f32.xlu0 %v4037_v21  ;;  %v4034_v26 = vsel %vm248_vm2, %v4028_v25, 0.0 }
0x1db6   :  { %4035 = vadd.xlane.f32.xlu1 %v4034_v26  ;;  %4989 = vmatprep.subr.bf16.mxu1 %v4988_v36 }
0x1db7   :  { %4991 = vmatpush3.bf16.msra.mxu1 %v4988_v36 }
0x1db8   :  { %4993 = vmatprep.subr.bf16.mxu1 %v4992_v39 }
0x1dbb   :  { %4995 = vmatpush3.bf16.msra.mxu1 %v4992_v39 }
0x1e42   :  { %v4039_v27 = vpop.xlane.xlu0 %4038 }
0x1e43   :  { %v4041_v28 = vmul.f32 0.03125, %v4039_v27  ;;  %v4036_v29 = vpop.xlane.xlu1 %4035  ;;  %v4316_v27 = vld [vmem:[%s5955_s15] sm:$0xff] }
0x1e44   :  { %v4040_v30 = vmul.f32 0.03125, %v4036_v29 }
0x1e45   :  { %v4043_v31 = vsub.f32 %v4029_v24, %v4041_v28  ;;  %v4317_v28 = vld [vmem:[%s5955_s15 + $0x8] sm:$0xff] }
0x1e46   :  { %v4042_v32 = vsub.f32 %v4028_v25, %v4040_v30  ;;  %v5005_v29 = vpack.c.bf16 %v4317_v28, %v4316_v27  ;;  %v4318_v30 = vld [vmem:[%s5955_s15 + $0x10] sm:$0xff] }
0x1e47   :  { %v4045_v33 = vmul.f32 %v4043_v31, %v4043_v31 }
0x1e48   :  { %v4044_v22 = vmul.f32 %v4042_v32, %v4042_v32 }
0x1e49   :  { %v4049_v34 = vsel %vm248_vm2, %v4045_v33, 0.0 }
0x1e4a   :  { %4050 = vadd.xlane.f32.xlu0 %v4049_v34  ;;  %v4046_v62 = vsel %vm248_vm2, %v4044_v22, 0.0 }
0x1e4b   :  { %4047 = vadd.xlane.f32.xlu1 %v4046_v62 }
0x1ed7   :  { %v4051_v43 = vpop.xlane.xlu0 %4050 }
0x1ed8   :  { %v4053_v44 = vmul.f32 0.03125, %v4051_v43  ;;  %v4048_v45 = vpop.xlane.xlu1 %4047 }
0x1ed9   :  { %v4052_v46 = vmul.f32 0.03125, %v4048_v45 }
0x1eda   :  { %v4055_v47 = vadd.f32 1e-05, %v4053_v44 }
0x1edb   :  { %v4054_v48 = vadd.f32 1e-05, %v4052_v46 }
0x1edc   :  { %5121 = vrsqrt.f32 %v4055_v47 }
0x1edd   :  { %5123 = vrsqrt.f32 %v4054_v48 }
0x1ee6   :  { %v5122_v49 = vpop.eup %5121 }
0x1ee7   :  { %v5124_v16 = vpop.eup %5123  ;;  %v4059_v15 = vmul.f32 %v5122_v49, %v4043_v31  ;;  %v4319_v31 = vld [vmem:[%s5955_s15 + $0x18] sm:$0xff]  ;;  %v4529_v49 = vld [vmem:[%s5967_s20] ss:$0 sm:$0xff] }
0x1ee8   :  { %v4058_v51 = vmul.f32 %v5124_v16, %v4042_v32  ;;  %v5318_v32 = vmov 0.0|0.0   ;;  %v5008_v33 = vpack.c.bf16 %v4319_v31, %v4318_v30 }
0x1ee9   :  { %v4067_v53 = vmul.f32 %v4515_v50, %v4059_v15  ;;  %5004 = vmatprep.subr.bf16.mxu1 %v5318_v32 }
0x1eea   :  { %v4066_v54 = vmul.f32 %v4515_v50, %v4058_v51 }
0x1eeb   :  { %v4075_v56 = vadd.f32 %v4516_v52, %v4067_v53 }
0x1eec   :  { %v4074_v55 = vadd.f32 %v4516_v52, %v4066_v54 }
0x1eee   :  { %4927 = vmatprep.mubr.msk.f32.mxu1 %vm248_vm2, %v4074_v55 }
0x1eef   :  { %4928 = vmatmul.mubr.msk.f32.vlgmr.msra.gmra.mrb[42].mxu1 %vm248_vm2, %v4075_v56 }
0x1ef0   :  { %4949 = vmatprep.mubr.msk.f32.mxu1 %vm5306_vm3, %v5305_v17  ;;  %v4522_v17 = vld [vmem:[%s5952_s12 + $0x1] ss:$0 sm:$0xff]  ;;  %5006 = vmatpush3.bf16.msra.mxu1 %v5005_v29 }
0x1ef1   :  { %5007 = vmatprep.subr.bf16.mxu1 %v5318_v32 }
0x1ef4   :  { %5009 = vmatpush3.bf16.msra.mxu1 %v5008_v33 }
0x1fc2   :  { %v4929_v63 = vpop.f32.mrb[42].mxu1 }
0x1fc3   :  { %v4167_v0 = vadd.f32 %v4929_v63, %v4518_v60  ;;  %v4161_v2 = vpop.f32.mrb[43].mxu1 }
0x1fc4   :  { %v4162_v4 = vadd.f32 %v4518_v60, %v4161_v2 }
0x1fc5   :  { %v4171_v6 = vmax.f32 %v4167_v0, 0.0 }
0x1fc6   :  { %v4170_v5 = vmax.f32 %v4162_v4, 0.0 }
0x1fc8   :  { %4938 = vmatprep.mubr.msk.f32.mxu0 %vm248_vm2, %v4170_v5 }
0x1fc9   :  { %4939 = vmatmul.mubr.msk.f32.vlgmr.msra.gmra.mrb[36].mxu0 %vm248_vm2, %v4171_v6 }
0x209c   :  { %v4940_v3 = vpop.f32.mrb[36].mxu0 }
0x209d   :  { %v4263_v7 = vadd.f32 %v4940_v3, %v4522_v17  ;;  %v4257_v8 = vpop.f32.mrb[37].mxu0 }
0x209e   :  { %v4258_v9 = vadd.f32 %v4522_v17, %v4257_v8 }
0x209f   :  { %v4267_v10 = vadd.f32 %v4263_v7, %v4075_v56 }
0x20a0   :  { %v4266_v11 = vadd.f32 %v4258_v9, %v4074_v55 }
0x20a1   :  { %v4275_v12 = vsel %vm248_vm2, %v4267_v10, 0.0 }
0x20a2   :  { %4276 = vadd.xlane.f32.xlu0 %v4275_v12  ;;  %v4272_v13 = vsel %vm248_vm2, %v4266_v11, 0.0 }
0x20a3   :  { %4273 = vadd.xlane.f32.xlu1 %v4272_v13 }
0x212f   :  { %v4277_v14 = vpop.xlane.xlu0 %4276 }
0x2130   :  { %v4279_v1 = vmul.f32 0.03125, %v4277_v14  ;;  %v4274_v18 = vpop.xlane.xlu1 %4273 }
0x2131   :  { %v4278_v19 = vmul.f32 0.03125, %v4274_v18 }
0x2132   :  { %v4281_v20 = vsub.f32 %v4267_v10, %v4279_v1 }
0x2133   :  { %v4280_v23 = vsub.f32 %v4266_v11, %v4278_v19 }
0x2134   :  { %v4283_v24 = vmul.f32 %v4281_v20, %v4281_v20 }
0x2135   :  { %v4282_v25 = vmul.f32 %v4280_v23, %v4280_v23 }
0x2136   :  { %v4287_v21 = vsel %vm248_vm2, %v4283_v24, 0.0 }
0x2137   :  { %4288 = vadd.xlane.f32.xlu0 %v4287_v21  ;;  %v4284_v26 = vsel %vm248_vm2, %v4282_v25, 0.0 }
0x2138   :  { %4285 = vadd.xlane.f32.xlu1 %v4284_v26 }
0x21c4   :  { %v4289_v22 = vpop.xlane.xlu0 %4288 }
0x21c5   :  { %v4291_v34 = vmul.f32 0.03125, %v4289_v22  ;;  %v4286_v62 = vpop.xlane.xlu1 %4285 }
0x21c6   :  { %v4290_v61 = vmul.f32 0.03125, %v4286_v62 }
0x21c7   :  { %v4293_v35 = vadd.f32 1e-05, %v4291_v34 }
0x21c8   :  { %v4292_v36 = vadd.f32 1e-05, %v4290_v61 }
0x21c9   :  { %5125 = vrsqrt.f32 %v4293_v35 }
0x21ca   :  { %5127 = vrsqrt.f32 %v4292_v36 }
0x21d3   :  { %v5126_v37 = vpop.eup %5125 }
0x21d4   :  { %v5128_v39 = vpop.eup %5127  ;;  %v4297_v40 = vmul.f32 %v5126_v37, %v4281_v20 }
0x21d5   :  { %v4296_v41 = vmul.f32 %v5128_v39, %v4280_v23 }
0x21d6   :  { %v4305_v43 = vmul.f32 %v4527_v38, %v4297_v40 }
0x21d7   :  { %v4304_v44 = vmul.f32 %v4527_v38, %v4296_v41 }
0x21d8   :  { %v4313_v45 = vadd.f32 %v4528_v42, %v4305_v43 }
0x21d9   :  { %v4312_v46 = vadd.f32 %v4528_v42, %v4304_v44 }
0x21db   :  { %v4314_v47 = vadd.f32 %v4313_v45, %v4312_v46 }
0x21dd   :  { %v4315_v48 = vmul.f32 0.5, %v4314_v47 }
0x21df   :  { %4950 = vmatmul.mubr.msk.f32.vlgmr.msra.gmra.mrb[44].mxu1 %vm248_vm2, %v4315_v48 }
0x22b2   :  { %v4396_v50 = vpop.f32.mrb[44].mxu1 }
0x22b3   :  { %v4397_v16 = vadd.f32 %v4529_v49, %v4396_v50  ;;  %v4951_v15 = vpop.f32.mrb[45].mxu1 }
0x22b5   :  { %v4531_v51 = vmul.f32 -1.442695, %v4397_v16 }
0x22b7   :  { %5129 = vpow2.f32 %v4531_v51 }
0x22c1   :  { %v5130_v52 = vpop.eup %5129 }
0x22c2   :  { %v4403_v53 = vadd.f32 1.0, %v5130_v52 }
0x22c4   :  { %5131 = vrcp.f32 %v4403_v53 }
0x22ce   :  { %v5132_v54 = vpop.eup %5131 }
0x22cf   :  { %4406 = vst [vmem:[#allocation13] sm:$0xff] %v5132_v54 }
0x22d0   :  { %5276 = shalt.err (!%p5273_p10)
}
0x22d1   :  { %s5968_s24 = sld [smem:[#allocation22_spill]] }
0x22d7   :  { %s5277_s4 = scalar_lea.hbm %s5968_s24, 128 }
0x22d8   :  { %p5278_p11 = scmp.ne.s32.totalorder %s5968_s24, %s5277_s4  ;;  %p5281_p12 = scmp.lt.u32.totalorder %s5277_s4, %s5968_s24 }
0x22da   :  { %p5283_p13 = pnand %p5281_p12, %p5278_p11 }
0x22dc   :  { %5286 = shalt.err (!%p5283_p13)
}
0x22dd   :  { %4416 = dma.vmem_to_hbm [thread:$0]  %s4414_s14, 128, %s5968_s24, [#allocation4]  }
0x22de   :  { %5295 = dma.done.wait [#allocation4], 128  }
0x22df   :  { %5296 = vsyncadd [#allocation4], 4294967168 }
0x22e0   :  { %4420 = vsyncpa [#allocation3], 1 }
0x22e1   :  { %4421 = vsyncpa [#allocation6], 1 }
0x22e2   :  { %4422 = vsyncpa [#allocation9], 1 }
0x22e3   :  { %4423 = vsyncpa [#allocation12], 1 }
0x22e4   :  { %4424 = vsyncpa [#allocation4], 1 }

</bundles_post_ra>
